<compile_context>
chip_gen: v7x
topology: tpu7x:2x2x1
jax: 0.10.0
libtpu: 0.0.40
codegen_flags: <defaults>
</compile_context>

<pallas_src>
import jax
import jax.numpy as jnp
import numpy as np
from jax.experimental import pallas as pl
from jax.experimental.pallas import tpu as pltpu

# ---------------- synthetic config (small, lane-dense) ----------------
NUM_USERS = 64
NUM_ITEMS = 64
N_NODES = NUM_USERS + NUM_ITEMS          # 128
LATENT_DIM = 256                         # config['latent_dim_rec']
GAT_DIM = LATENT_DIM // 2                # SpGraphAttentionLayer output dim = 128 (lane-dense)
N_LAYERS = 3                             # config['lightGCN_n_layers']
LEAKY_ALPHA = 0.2
BATCH = 8


# ---------------- fused Pallas kernel ----------------
def fused_lightgcn_kernel(u_ref, i_ref,                            # (B,1) int32 indices
                          ue_ref, ie_ref, wcat_ref, adj_ref, prop_ref,  # bf16 VMEM inputs
                          gamma_ref):                              # (B,1) f32 output
    # ---- concat user/item embeddings (already bf16) inside VMEM ----
    x = jnp.concatenate([ue_ref[...], ie_ref[...]], axis=0)        # (N, D) bf16

    # ---- GAT projection with folded attention reductions ----
    # wcat = [W | W@a1^T | W@a2^T]: one bf16 MXU pass yields h, f, g.
    h_all = jnp.dot(x, wcat_ref[...],
                    preferred_element_type=jnp.float32)            # (N, GAT_DIM + 2) f32
    h = h_all[:, :GAT_DIM]                                         # (N, GAT_DIM)
    f = h_all[:, GAT_DIM:GAT_DIM + 1]                              # (N, 1)  = a1 . h_i
    g = h_all[:, GAT_DIM + 1:GAT_DIM + 2]                          # (N, 1)  = a2 . h_j

    adj = adj_ref[...]                                             # (N, N) bf16 (edge mask)
    logits = f + jnp.transpose(g)                                  # (N, N) f32
    # negate folded into the LeakyReLU select: neg_z = -LeakyReLU(logits)
    neg_z = jnp.where(logits > 0, -logits, (-LEAKY_ALPHA) * logits)
    # fused mask + exp: masked-out entries never see the exp result (NaN-safe).
    e = jnp.where(adj != 0, jnp.exp(neg_z), 0.0)                   # edge_e (N, N) f32

    rowsum = jnp.sum(e, axis=-1, keepdims=True)                    # (N, 1)
    # EUP approx reciprocal; guard degree-0 rows (torch would NaN there).
    inv = jnp.where(rowsum > 0.0, pl.reciprocal(rowsum, approx=True), 0.0)
    h_prime = jnp.dot(e.astype(jnp.bfloat16), h.astype(jnp.bfloat16),
                      preferred_element_type=jnp.float32) * inv    # (N, GAT_DIM)
    emb = jnp.where(h_prime > 0, h_prime, jnp.exp(h_prime) - 1.0)  # ELU (concat=True)

    # ---- LightGCN propagation + mean over layers as ONE matmul with precomputed P ----
    light = jnp.dot(prop_ref[...], emb.astype(jnp.bfloat16),
                    preferred_element_type=jnp.float32)            # (N, GAT_DIM)

    # ---- one-hot MXU gather + pairwise score (no dynamic slices, no scratch) ----
    node_ids = jax.lax.broadcasted_iota(jnp.int32, (BATCH, N_NODES), 1)   # (B, N)
    onehot_u = (node_ids == u_ref[...]).astype(jnp.bfloat16)              # (B, N)
    onehot_i = (node_ids == (i_ref[...] + NUM_USERS)).astype(jnp.bfloat16)
    light_b = light.astype(jnp.bfloat16)
    um = jnp.dot(onehot_u, light_b, preferred_element_type=jnp.float32)   # (B, GAT_DIM)
    im = jnp.dot(onehot_i, light_b, preferred_element_type=jnp.float32)   # (B, GAT_DIM)
    gamma_ref[...] = jnp.sum(um * im, axis=-1, keepdims=True)             # (B, 1)


# ---------------- wrapper ----------------
@jax.jit
def lightgcn_forward(users, items, user_emb, item_emb, W, a1, a2, adj):
    # Fold attention vectors into the projection: f = (xW).a1 = x.(W a1^T), same for g.
    wcat = jnp.concatenate([W, W @ a1.T, W @ a2.T], axis=1).astype(jnp.bfloat16)

    # Precompute P = (I + A + A^2 + ... + A^L) / (L+1)  (depends only on adj; reusable).
    eye = jnp.eye(N_NODES, dtype=jnp.float32)
    prop = eye
    ak = eye
    for _ in range(N_LAYERS):
        ak = ak @ adj
        prop = prop + ak
    prop = (prop * (1.0 / (N_LAYERS + 1))).astype(jnp.bfloat16)

    u_col = users.reshape(BATCH, 1).astype(jnp.int32)
    i_col = items.reshape(BATCH, 1).astype(jnp.int32)

    grid_spec = pltpu.PrefetchScalarGridSpec(
        num_scalar_prefetch=0,
        grid=(1,),
        in_specs=[
            pl.BlockSpec((BATCH, 1), lambda i: (0, 0)),                    # users
            pl.BlockSpec((BATCH, 1), lambda i: (0, 0)),                    # items
            pl.BlockSpec((NUM_USERS, LATENT_DIM), lambda i: (0, 0)),       # user_emb bf16
            pl.BlockSpec((NUM_ITEMS, LATENT_DIM), lambda i: (0, 0)),       # item_emb bf16
            pl.BlockSpec((LATENT_DIM, GAT_DIM + 2), lambda i: (0, 0)),     # wcat bf16
            pl.BlockSpec((N_NODES, N_NODES), lambda i: (0, 0)),            # adj bf16 (mask)
            pl.BlockSpec((N_NODES, N_NODES), lambda i: (0, 0)),            # P bf16
        ],
        out_specs=pl.BlockSpec((BATCH, 1), lambda i: (0, 0)),
    )
    gamma = pl.pallas_call(
        fused_lightgcn_kernel,
        out_shape=jax.ShapeDtypeStruct((BATCH, 1), jnp.float32),
        grid_spec=grid_spec,
        compiler_params=pltpu.CompilerParams(
            dimension_semantics=("arbitrary",),
            vmem_limit_bytes=16 * 1024 * 1024,
        ),
    )(u_col, i_col,
      user_emb.astype(jnp.bfloat16), item_emb.astype(jnp.bfloat16),
      wcat, adj.astype(jnp.bfloat16), prop)
    return gamma[:, 0]                                                     # (B,)


# ---------------- pure-JAX reference (numerically mirrors the kernel) ----------------
def reference_forward(users, items, user_emb, item_emb, W, a1, a2, adj):
    x = jnp.concatenate([user_emb, item_emb], axis=0).astype(jnp.bfloat16)
    wcat = jnp.concatenate([W, W @ a1.T, W @ a2.T], axis=1).astype(jnp.bfloat16)
    h_all = jnp.dot(x, wcat, preferred_element_type=jnp.float32)
    h = h_all[:, :GAT_DIM]
    f = h_all[:, GAT_DIM:GAT_DIM + 1]
    g = h_all[:, GAT_DIM + 1:GAT_DIM + 2]
    adj_b = adj.astype(jnp.bfloat16)
    logits = f + g.T
    z = jnp.where(logits > 0, logits, LEAKY_ALPHA * logits)
    e = jnp.where(adj_b != 0, jnp.exp(-z), 0.0)
    rowsum = jnp.sum(e, axis=-1, keepdims=True)
    inv = jnp.where(rowsum > 0.0, 1.0 / rowsum, 0.0)
    h_prime = jnp.dot(e.astype(jnp.bfloat16), h.astype(jnp.bfloat16),
                      preferred_element_type=jnp.float32) * inv
    emb = jnp.where(h_prime > 0, h_prime, jnp.exp(h_prime) - 1.0)
    eye = jnp.eye(N_NODES, dtype=jnp.float32)
    prop = eye
    ak = eye
    for _ in range(N_LAYERS):
        ak = ak @ adj
        prop = prop + ak
    prop = (prop * (1.0 / (N_LAYERS + 1))).astype(jnp.bfloat16)
    light = jnp.dot(prop, emb.astype(jnp.bfloat16), preferred_element_type=jnp.float32)
    light = light.astype(jnp.bfloat16).astype(jnp.float32)   # mirrors in-kernel bf16 gather
    au, ai = light[:NUM_USERS], light[NUM_USERS:]
    return jnp.sum(au[users] * ai[items], axis=1)


# ---------------- deterministic parameter / graph construction ----------------
def build_params_and_graph():
    key = jax.random.PRNGKey(0)
    k_u, k_i, k_w, k_a, k_r, k_q = jax.random.split(key, 6)

    # nn.init.normal_(std=0.1) embeddings
    user_emb = 0.1 * jax.random.normal(k_u, (NUM_USERS, LATENT_DIM), jnp.float32)
    item_emb = 0.1 * jax.random.normal(k_i, (NUM_ITEMS, LATENT_DIM), jnp.float32)

    # GAT params: W (D, D//2), a (1, 2*(D//2)) split into a1/a2
    W = 0.1 * jax.random.normal(k_w, (LATENT_DIM, GAT_DIM), jnp.float32)
    a = 0.1 * jax.random.normal(k_a, (1, 2 * GAT_DIM), jnp.float32)
    a1 = a[:, :GAT_DIM]
    a2 = a[:, GAT_DIM:]

    # synthetic bipartite interaction matrix R, every user/item has >= 1 edge
    R = (jax.random.uniform(k_r, (NUM_USERS, NUM_ITEMS)) < 0.1).astype(jnp.float32)
    R = R.at[jnp.arange(NUM_USERS), jnp.arange(NUM_USERS) % NUM_ITEMS].set(1.0)
    R = R.at[jnp.arange(NUM_ITEMS) % NUM_USERS, jnp.arange(NUM_ITEMS)].set(1.0)

    # dense normalized adjacency  A = D^-1/2 [[0,R],[R^T,0]] D^-1/2
    A = jnp.zeros((N_NODES, N_NODES), jnp.float32)
    A = A.at[:NUM_USERS, NUM_USERS:].set(R)
    A = A.at[NUM_USERS:, :NUM_USERS].set(R.T)
    deg = jnp.sum(A, axis=1)
    d_inv_sqrt = jnp.where(deg > 0, 1.0 / jnp.sqrt(deg), 0.0)
    adj = d_inv_sqrt[:, None] * A * d_inv_sqrt[None, :]

    users = jax.random.randint(k_q, (BATCH,), 0, NUM_USERS, dtype=jnp.int32)
    items = jax.random.randint(jax.random.fold_in(k_q, 1), (BATCH,), 0, NUM_ITEMS,
                               dtype=jnp.int32)
    return users, items, user_emb, item_emb, W, a1, a2, adj


if __name__ == "__main__":
    users, items, user_emb, item_emb, W, a1, a2, adj = build_params_and_graph()

    gamma = lightgcn_forward(users, items, user_emb, item_emb, W, a1, a2, adj)
    gamma = jax.block_until_ready(gamma)

    ref = reference_forward(users, items, user_emb, item_emb, W, a1, a2, adj)
    np.testing.assert_allclose(np.asarray(gamma), np.asarray(ref), rtol=5e-3, atol=5e-3)

    print("KERNEL_OK")
</pallas_src>

<mosaic_0001>
module attributes {stable_mosaic.version = 11 : i64} {
  func.func @fused_lightgcn_kernel(%arg0: i32, %arg1: memref<8x1xi32, #tpu.memory_space<vmem>>, %arg2: memref<8x1xi32, #tpu.memory_space<vmem>>, %arg3: memref<64x256xbf16, #tpu.memory_space<vmem>>, %arg4: memref<64x256xbf16, #tpu.memory_space<vmem>>, %arg5: memref<256x130xbf16, #tpu.memory_space<vmem>>, %arg6: memref<128x128xbf16, #tpu.memory_space<vmem>>, %arg7: memref<128x128xbf16, #tpu.memory_space<vmem>>, %arg8: memref<8x1xf32, #tpu.memory_space<vmem>>) attributes {dimension_semantics = [#tpu.dimension_semantics<arbitrary>], iteration_bounds = array<i64: 1>, scalar_prefetch = 0 : i64, scratch_operands = 0 : i64, tpu.core_type = #tpu.core_type<tc>, window_params = [{pipeline_mode = #tpu.pipeline_mode<synchronous>, transform_indices = @transform_0, window_bounds = array<i64: 8, 1>}, {pipeline_mode = #tpu.pipeline_mode<synchronous>, transform_indices = @transform_1, window_bounds = array<i64: 8, 1>}, {pipeline_mode = #tpu.pipeline_mode<synchronous>, transform_indices = @transform_2, window_bounds = array<i64: 64, 256>}, {pipeline_mode = #tpu.pipeline_mode<synchronous>, transform_indices = @transform_3, window_bounds = array<i64: 64, 256>}, {pipeline_mode = #tpu.pipeline_mode<synchronous>, transform_indices = @transform_4, window_bounds = array<i64: 256, 130>}, {pipeline_mode = #tpu.pipeline_mode<synchronous>, transform_indices = @transform_5, window_bounds = array<i64: 128, 128>}, {pipeline_mode = #tpu.pipeline_mode<synchronous>, transform_indices = @transform_6, window_bounds = array<i64: 128, 128>}, {pipeline_mode = #tpu.pipeline_mode<synchronous>, transform_indices = @transform_7, window_bounds = array<i64: 8, 1>}]} {
    %c0 = arith.constant 0 : index
    %c0_0 = arith.constant 0 : index
    %0 = vector.load %arg3[%c0, %c0_0] : memref<64x256xbf16, #tpu.memory_space<vmem>>, vector<64x256xbf16>
    %c0_1 = arith.constant 0 : index
    %c0_2 = arith.constant 0 : index
    %1 = vector.load %arg4[%c0_1, %c0_2] : memref<64x256xbf16, #tpu.memory_space<vmem>>, vector<64x256xbf16>
    %2 = tpu.concatenate %0, %1 in 0 : vector<64x256xbf16>, vector<64x256xbf16> -> vector<128x256xbf16>
    %c0_3 = arith.constant 0 : index
    %c0_4 = arith.constant 0 : index
    %3 = vector.load %arg5[%c0_3, %c0_4] : memref<256x130xbf16, #tpu.memory_space<vmem>>, vector<256x130xbf16>
    %cst = arith.constant dense<0.000000e+00> : vector<128x130xf32>
    %4 = tpu.matmul %2, %3, %cst {dimension_numbers = #tpu.dot_dimension_numbers<[1], [0], [0], [1], [0, 0, 1, 1], [], []>} : vector<128x256xbf16>, vector<256x130xbf16>, vector<128x130xf32> -> vector<128x130xf32>
    %5 = vector.extract_strided_slice %4 {offsets = [0, 0], sizes = [128, 128], strides = [1, 1]} : vector<128x130xf32> to vector<128x128xf32>
    %6 = vector.extract_strided_slice %4 {offsets = [0, 128], sizes = [128, 1], strides = [1, 1]} : vector<128x130xf32> to vector<128x1xf32>
    %7 = vector.extract_strided_slice %4 {offsets = [0, 129], sizes = [128, 1], strides = [1, 1]} : vector<128x130xf32> to vector<128x1xf32>
    %c0_5 = arith.constant 0 : index
    %c0_6 = arith.constant 0 : index
    %8 = vector.load %arg6[%c0_5, %c0_6] : memref<128x128xbf16, #tpu.memory_space<vmem>>, vector<128x128xbf16>
    %9 = tpu.transpose %7, [1, 0] : vector<128x1xf32> -> vector<1x128xf32>
    %10 = vector.broadcast %6 : vector<128x1xf32> to vector<128x128xf32>
    %11 = vector.broadcast %9 : vector<1x128xf32> to vector<128x128xf32>
    %12 = arith.addf %10, %11 : vector<128x128xf32>
    %cst_7 = arith.constant 0.000000e+00 : f32
    %13 = vector.broadcast %cst_7 : f32 to vector<128x128xf32>
    %14 = arith.cmpf ogt, %12, %13 : vector<128x128xf32>
    %cst_8 = arith.constant 0.000000e+00 : f32
    %15 = vector.broadcast %cst_8 : f32 to vector<128x128xf32>
    %16 = arith.subf %15, %12 : vector<128x128xf32>
    %cst_9 = arith.constant -2.000000e-01 : f32
    %17 = vector.broadcast %cst_9 : f32 to vector<128x128xf32>
    %18 = arith.mulf %17, %12 : vector<128x128xf32>
    %19 = arith.select %14, %16, %18 : vector<128x128xi1>, vector<128x128xf32>
    %cst_10 = arith.constant 0.000000e+00 : bf16
    %20 = vector.broadcast %cst_10 : bf16 to vector<128x128xbf16>
    %21 = arith.cmpf one, %8, %20 : vector<128x128xbf16>
    %22 = math.exp %19 : vector<128x128xf32>
    %cst_11 = arith.constant 0.000000e+00 : f32
    %23 = vector.broadcast %cst_11 : f32 to vector<128x128xf32>
    %24 = arith.select %21, %22, %23 : vector<128x128xi1>, vector<128x128xf32>
    %cst_12 = arith.constant dense<0.000000e+00> : vector<128xf32>
    %25 = vector.multi_reduction <add>, %24, %cst_12 [1] : vector<128x128xf32> to vector<128xf32>
    %26 = vector.shape_cast %25 : vector<128xf32> to vector<128x1xf32>
    %cst_13 = arith.constant 0.000000e+00 : f32
    %27 = vector.broadcast %cst_13 : f32 to vector<128x1xf32>
    %28 = arith.cmpf ogt, %26, %27 : vector<128x1xf32>
    %29 = tpu.reciprocal %26 {approx = true} : vector<128x1xf32> -> vector<128x1xf32>
    %cst_14 = arith.constant 0.000000e+00 : f32
    %30 = vector.broadcast %cst_14 : f32 to vector<128x1xf32>
    %31 = arith.select %28, %29, %30 : vector<128x1xi1>, vector<128x1xf32>
    %32 = arith.truncf %24 : vector<128x128xf32> to vector<128x128xbf16>
    %33 = arith.truncf %5 : vector<128x128xf32> to vector<128x128xbf16>
    %cst_15 = arith.constant dense<0.000000e+00> : vector<128x128xf32>
    %34 = tpu.matmul %32, %33, %cst_15 {dimension_numbers = #tpu.dot_dimension_numbers<[1], [0], [0], [1], [0, 0, 1, 1], [], []>} : vector<128x128xbf16>, vector<128x128xbf16>, vector<128x128xf32> -> vector<128x128xf32>
    %35 = vector.broadcast %31 : vector<128x1xf32> to vector<128x128xf32>
    %36 = arith.mulf %34, %35 : vector<128x128xf32>
    %cst_16 = arith.constant 0.000000e+00 : f32
    %37 = vector.broadcast %cst_16 : f32 to vector<128x128xf32>
    %38 = arith.cmpf ogt, %36, %37 : vector<128x128xf32>
    %39 = math.exp %36 : vector<128x128xf32>
    %cst_17 = arith.constant 1.000000e+00 : f32
    %40 = vector.broadcast %cst_17 : f32 to vector<128x128xf32>
    %41 = arith.subf %39, %40 : vector<128x128xf32>
    %42 = arith.select %38, %36, %41 : vector<128x128xi1>, vector<128x128xf32>
    %c0_18 = arith.constant 0 : index
    %c0_19 = arith.constant 0 : index
    %43 = vector.load %arg7[%c0_18, %c0_19] : memref<128x128xbf16, #tpu.memory_space<vmem>>, vector<128x128xbf16>
    %44 = arith.truncf %42 : vector<128x128xf32> to vector<128x128xbf16>
    %cst_20 = arith.constant dense<0.000000e+00> : vector<128x128xf32>
    %45 = tpu.matmul %43, %44, %cst_20 {dimension_numbers = #tpu.dot_dimension_numbers<[1], [0], [0], [1], [0, 0, 1, 1], [], []>} : vector<128x128xbf16>, vector<128x128xbf16>, vector<128x128xf32> -> vector<128x128xf32>
    %46 = tpu.iota {dimensions = array<i32: 1>} : vector<8x128xi32>
    %c0_21 = arith.constant 0 : index
    %c0_22 = arith.constant 0 : index
    %47 = vector.load %arg1[%c0_21, %c0_22] : memref<8x1xi32, #tpu.memory_space<vmem>>, vector<8x1xi32>
    %48 = vector.broadcast %47 : vector<8x1xi32> to vector<8x128xi32>
    %49 = arith.cmpi eq, %46, %48 : vector<8x128xi32>
    %50 = arith.extui %49 : vector<8x128xi1> to vector<8x128xi32>
    %51 = arith.sitofp %50 : vector<8x128xi32> to vector<8x128xf32>
    %52 = arith.truncf %51 : vector<8x128xf32> to vector<8x128xbf16>
    %c0_23 = arith.constant 0 : index
    %c0_24 = arith.constant 0 : index
    %53 = vector.load %arg2[%c0_23, %c0_24] : memref<8x1xi32, #tpu.memory_space<vmem>>, vector<8x1xi32>
    %c64_i32 = arith.constant 64 : i32
    %54 = vector.broadcast %c64_i32 : i32 to vector<8x1xi32>
    %55 = arith.addi %53, %54 : vector<8x1xi32>
    %56 = vector.broadcast %55 : vector<8x1xi32> to vector<8x128xi32>
    %57 = arith.cmpi eq, %46, %56 : vector<8x128xi32>
    %58 = arith.extui %57 : vector<8x128xi1> to vector<8x128xi32>
    %59 = arith.sitofp %58 : vector<8x128xi32> to vector<8x128xf32>
    %60 = arith.truncf %59 : vector<8x128xf32> to vector<8x128xbf16>
    %61 = arith.truncf %45 : vector<128x128xf32> to vector<128x128xbf16>
    %cst_25 = arith.constant dense<0.000000e+00> : vector<8x128xf32>
    %62 = tpu.matmul %52, %61, %cst_25 {dimension_numbers = #tpu.dot_dimension_numbers<[1], [0], [0], [1], [0, 0, 1, 1], [], []>} : vector<8x128xbf16>, vector<128x128xbf16>, vector<8x128xf32> -> vector<8x128xf32>
    %cst_26 = arith.constant dense<0.000000e+00> : vector<8x128xf32>
    %63 = tpu.matmul %60, %61, %cst_26 {dimension_numbers = #tpu.dot_dimension_numbers<[1], [0], [0], [1], [0, 0, 1, 1], [], []>} : vector<8x128xbf16>, vector<128x128xbf16>, vector<8x128xf32> -> vector<8x128xf32>
    %64 = arith.mulf %62, %63 : vector<8x128xf32>
    %cst_27 = arith.constant dense<0.000000e+00> : vector<8xf32>
    %65 = vector.multi_reduction <add>, %64, %cst_27 [1] : vector<8x128xf32> to vector<8xf32>
    %66 = vector.shape_cast %65 : vector<8xf32> to vector<8x1xf32>
    %c0_28 = arith.constant 0 : index
    %c0_29 = arith.constant 0 : index
    %67 = vector.load %arg8[%c0_28, %c0_29] : memref<8x1xf32, #tpu.memory_space<vmem>>, vector<8x1xf32>
    tpu.vector_store %arg8[%c0_28, %c0_29], %66 {strides = array<i32>} : memref<8x1xf32, #tpu.memory_space<vmem>>, vector<8x1xf32>,
    return
  }
  func.func @transform_0(%arg0: i32) -> (i32, i32) {
    %c0_i32 = arith.constant 0 : i32
    %c0_i32_0 = arith.constant 0 : i32
    %c0_i32_1 = arith.constant 0 : i32
    return %c0_i32, %c0_i32_0 : i32, i32
  }
  func.func @transform_1(%arg0: i32) -> (i32, i32) {
    %c0_i32 = arith.constant 0 : i32
    %c0_i32_0 = arith.constant 0 : i32
    %c0_i32_1 = arith.constant 0 : i32
    return %c0_i32, %c0_i32_0 : i32, i32
  }
  func.func @transform_2(%arg0: i32) -> (i32, i32) {
    %c0_i32 = arith.constant 0 : i32
    %c0_i32_0 = arith.constant 0 : i32
    %c0_i32_1 = arith.constant 0 : i32
    return %c0_i32, %c0_i32_0 : i32, i32
  }
  func.func @transform_3(%arg0: i32) -> (i32, i32) {
    %c0_i32 = arith.constant 0 : i32
    %c0_i32_0 = arith.constant 0 : i32
    %c0_i32_1 = arith.constant 0 : i32
    return %c0_i32, %c0_i32_0 : i32, i32
  }
  func.func @transform_4(%arg0: i32) -> (i32, i32) {
    %c0_i32 = arith.constant 0 : i32
    %c0_i32_0 = arith.constant 0 : i32
    %c0_i32_1 = arith.constant 0 : i32
    return %c0_i32, %c0_i32_0 : i32, i32
  }
  func.func @transform_5(%arg0: i32) -> (i32, i32) {
    %c0_i32 = arith.constant 0 : i32
    %c0_i32_0 = arith.constant 0 : i32
    %c0_i32_1 = arith.constant 0 : i32
    return %c0_i32, %c0_i32_0 : i32, i32
  }
  func.func @transform_6(%arg0: i32) -> (i32, i32) {
    %c0_i32 = arith.constant 0 : i32
    %c0_i32_0 = arith.constant 0 : i32
    %c0_i32_1 = arith.constant 0 : i32
    return %c0_i32, %c0_i32_0 : i32, i32
  }
  func.func @transform_7(%arg0: i32) -> (i32, i32) {
    %c0_i32 = arith.constant 0 : i32
    %c0_i32_0 = arith.constant 0 : i32
    %c0_i32_1 = arith.constant 0 : i32
    return %c0_i32, %c0_i32_0 : i32, i32
  }
}

</mosaic_0001>

<bundles_post_ra>
// kernel: lightgcn_forward.1
= control target key start
LH: loop header
LB: loop body
LE: loop exit
PB: predicated region body
PF: predicated region fallthrough
CT: control target
= control target key end

     0   :  { %v1815_v48 = vmov 0   ;;  %s1816_s26 = smov 127   ;;  %s2518_s4 = inlined_call_operand.vmem [shape: bf16[256,130], index: 4, kind: input, shape index: {}]   ;;  %s2519_s2 = inlined_call_operand.vmem [shape: bf16[64,256], index: 2, kind: input, shape index: {}]   ;;  %s2520_s3 = inlined_call_operand.vmem [shape: bf16[64,256], index: 3, kind: input, shape index: {}]   ;;  %s2521_s1 = inlined_call_operand.vmem [shape: s32[8,1], index: 1, kind: input, shape index: {}]   ;;  %s2522_s5 = inlined_call_operand.vmem [shape: bf16[128,128], index: 5, kind: input, shape index: {}]   ;;  %s2523_s0 = inlined_call_operand.vmem [shape: s32[8,1], index: 0, kind: input, shape index: {}]   ;;  %s2524_s6 = inlined_call_operand.vmem [shape: bf16[128,128], index: 6, kind: input, shape index: {}]   ;;  %s2525_s7 = inlined_call_operand.vmem [shape: f32[8,1], index: 7, kind: output, shape index: {}]  }
   0x1   :  { %v1639_v0 = vld [vmem:[%s2518_s4 + $0x4] ss:$8 sps:$4 sm:$0xff]   ;;  %v1641_v1 = vld [vmem:[%s2518_s4] ss:$8 sps:$4 sm:$0xff]   ;;  %v1642_v2 = vld [vmem:[%s2518_s4 + $0x14] ss:$8 sps:$4 sm:$0xff]   ;;  %1638 = vset.pattern.permute.xlu1 %v1815_v48  ;;  %1637 = vset.pattern.permute.xlu0 %v1815_v48 }
   0x2   :  { %317 = vmatprep.subr.bf16.mxu0 %v1639_v0  ;;  %v1644_v3 = vld [vmem:[%s2518_s4 + $0x10] ss:$8 sps:$4 sm:$0xff]   ;;  %v1645_v4 = vld [vmem:[%s2518_s4 + $0x24] ss:$8 sps:$4 sm:$0xff]   ;;  %v1647_v5 = vld [vmem:[%s2518_s4 + $0x20] ss:$8 sps:$4 sm:$0xff]  }
   0x3   :  { %318 = vmatpush1.bf16.msra.mxu0 %v1641_v1  ;;  %v1648_v6 = vld [vmem:[%s2518_s4 + $0x34] ss:$8 sps:$4 sm:$0xff]   ;;  %v1650_v7 = vld [vmem:[%s2518_s4 + $0x30] ss:$8 sps:$4 sm:$0xff]   ;;  %v1651_v8 = vld [vmem:[%s2518_s4 + $0x44] ss:$8 sps:$4 sm:$0xff]  }
   0x4   :  { %319 = vmatprep.subr.bf16.mxu0 %v1642_v2  ;;  %v1653_v9 = vld [vmem:[%s2518_s4 + $0x40] ss:$8 sps:$4 sm:$0xff]   ;;  %v1654_v10 = vld [vmem:[%s2518_s4 + $0x54] ss:$8 sps:$4 sm:$0xff]   ;;  %v1656_v11 = vld [vmem:[%s2518_s4 + $0x50] ss:$8 sps:$4 sm:$0xff]  }
   0x5   :  { %v1657_v12 = vld [vmem:[%s2518_s4 + $0x64] ss:$8 sps:$4 sm:$0xff]   ;;  %v1659_v14 = vld [vmem:[%s2518_s4 + $0x60] ss:$8 sps:$4 sm:$0xff]   ;;  %v1660_v15 = vld [vmem:[%s2518_s4 + $0x74] ss:$8 sps:$4 sm:$0xff]  }
   0x6   :  { %v1689_v13 = vld [vmem:[%s2519_s2 + $0x4] ss:$8 sps:$4 sm:$0xff]   ;;  %v1662_v16 = vld [vmem:[%s2518_s4 + $0x70] ss:$8 sps:$4 sm:$0xff]   ;;  %v1665_v18 = vld [vmem:[%s2518_s4 + $0x80] ss:$8 sps:$4 sm:$0xff]  }
   0x7   :  { %320 = vmatpush1.bf16.msra.mxu0 %v1644_v3  ;;  %349 = vmatprep.mubr.bf16.mxu0 %v1689_v13  ;;  %v1663_v17 = vld [vmem:[%s2518_s4 + $0x84] ss:$8 sps:$4 sm:$0xff]   ;;  %v1666_v19 = vld [vmem:[%s2518_s4 + $0x94] ss:$8 sps:$4 sm:$0xff]   ;;  %v1668_v20 = vld [vmem:[%s2518_s4 + $0x90] ss:$8 sps:$4 sm:$0xff]  }
   0x8   :  { %321 = vmatprep.subr.bf16.mxu0 %v1645_v4  ;;  %v1669_v21 = vld [vmem:[%s2518_s4 + $0xa4] ss:$8 sps:$4 sm:$0xff]   ;;  %v1671_v22 = vld [vmem:[%s2518_s4 + $0xa0] ss:$8 sps:$4 sm:$0xff]   ;;  %v1672_v23 = vld [vmem:[%s2518_s4 + $0xb4] ss:$8 sps:$4 sm:$0xff]  }
   0x9   :  { %v1674_v24 = vld [vmem:[%s2518_s4 + $0xb0] ss:$8 sps:$4 sm:$0xff]   ;;  %v1675_v25 = vld [vmem:[%s2518_s4 + $0xc4] ss:$8 sps:$4 sm:$0xff]   ;;  %v1677_v26 = vld [vmem:[%s2518_s4 + $0xc0] ss:$8 sps:$4 sm:$0xff]  }
   0xa   :  { %v1678_v27 = vld [vmem:[%s2518_s4 + $0xd4] ss:$8 sps:$4 sm:$0xff]   ;;  %v1680_v28 = vld [vmem:[%s2518_s4 + $0xd0] ss:$8 sps:$4 sm:$0xff]   ;;  %v1681_v29 = vld [vmem:[%s2518_s4 + $0xe4] ss:$8 sps:$4 sm:$0xff]  }
   0xb   :  { %322 = vmatpush1.bf16.msra.mxu0 %v1647_v5  ;;  %v1683_v30 = vld [vmem:[%s2518_s4 + $0xe0] ss:$8 sps:$4 sm:$0xff]   ;;  %v1684_v31 = vld [vmem:[%s2518_s4 + $0xf4] ss:$8 sps:$4 sm:$0xff]   ;;  %v1686_v32 = vld [vmem:[%s2518_s4 + $0xf0] ss:$8 sps:$4 sm:$0xff]  }
   0xc   :  { %323 = vmatprep.subr.bf16.mxu0 %v1648_v6  ;;  %v1687_v33 = vld [vmem:[%s2519_s2] ss:$8 sps:$4 sm:$0xff]   ;;  %v1690_v34 = vld [vmem:[%s2519_s2 + $0x14] ss:$8 sps:$4 sm:$0xff]   ;;  %v1692_v35 = vld [vmem:[%s2519_s2 + $0x10] ss:$8 sps:$4 sm:$0xff]  }
   0xd   :  { %v1693_v36 = vld [vmem:[%s2519_s2 + $0x24] ss:$8 sps:$4 sm:$0xff]   ;;  %v1695_v37 = vld [vmem:[%s2519_s2 + $0x20] ss:$8 sps:$4 sm:$0xff]   ;;  %v1696_v38 = vld [vmem:[%s2519_s2 + $0x34] ss:$8 sps:$4 sm:$0xff]  }
   0xe   :  { %v1698_v39 = vld [vmem:[%s2519_s2 + $0x30] ss:$8 sps:$4 sm:$0xff]   ;;  %v1699_v40 = vld [vmem:[%s2520_s3 + $0x4] ss:$8 sps:$4 sm:$0xff]   ;;  %v1701_v41 = vld [vmem:[%s2520_s3] ss:$8 sps:$4 sm:$0xff]  }
   0xf   :  { %324 = vmatpush1.bf16.msra.mxu0 %v1650_v7  ;;  %v1702_v42 = vld [vmem:[%s2520_s3 + $0x14] ss:$8 sps:$4 sm:$0xff]   ;;  %v1704_v43 = vld [vmem:[%s2520_s3 + $0x10] ss:$8 sps:$4 sm:$0xff]   ;;  %v1705_v44 = vld [vmem:[%s2520_s3 + $0x24] ss:$8 sps:$4 sm:$0xff]  }
  0x10   :  { %325 = vmatprep.subr.bf16.mxu0 %v1651_v8  ;;  %v1707_v45 = vld [vmem:[%s2520_s3 + $0x20] ss:$8 sps:$4 sm:$0xff]   ;;  %v1708_v46 = vld [vmem:[%s2520_s3 + $0x34] ss:$8 sps:$4 sm:$0xff]   ;;  %v1710_v47 = vld [vmem:[%s2520_s3 + $0x30] ss:$8 sps:$4 sm:$0xff]  }
  0x13   :  { %326 = vmatpush1.bf16.msra.mxu0 %v1653_v9 }
  0x14   :  { %327 = vmatprep.subr.bf16.mxu0 %v1654_v10 }
  0x17   :  { %328 = vmatpush1.bf16.msra.mxu0 %v1656_v11 }
  0x18   :  { %329 = vmatprep.subr.bf16.mxu0 %v1657_v12 }
  0x1b   :  { %330 = vmatpush1.bf16.msra.mxu0 %v1659_v14 }
  0x1c   :  { %331 = vmatprep.subr.bf16.mxu0 %v1660_v15 }
  0x1f   :  { %332 = vmatpush1.bf16.msra.mxu0 %v1662_v16 }
  0x20   :  { %333 = vmatprep.subr.bf16.mxu0 %v1663_v17 }
  0x23   :  { %334 = vmatpush1.bf16.msra.mxu0 %v1665_v18 }
  0x24   :  { %335 = vmatprep.subr.bf16.mxu0 %v1666_v19 }
  0x27   :  { %336 = vmatpush1.bf16.msra.mxu0 %v1668_v20 }
  0x28   :  { %337 = vmatprep.subr.bf16.mxu0 %v1669_v21 }
  0x2b   :  { %338 = vmatpush1.bf16.msra.mxu0 %v1671_v22 }
  0x2c   :  { %339 = vmatprep.subr.bf16.mxu0 %v1672_v23 }
  0x2f   :  { %340 = vmatpush1.bf16.msra.mxu0 %v1674_v24 }
  0x30   :  { %341 = vmatprep.subr.bf16.mxu0 %v1675_v25 }
  0x33   :  { %342 = vmatpush1.bf16.msra.mxu0 %v1677_v26 }
  0x34   :  { %343 = vmatprep.subr.bf16.mxu0 %v1678_v27 }
  0x37   :  { %344 = vmatpush1.bf16.msra.mxu0 %v1680_v28 }
  0x38   :  { %345 = vmatprep.subr.bf16.mxu0 %v1681_v29 }
  0x3b   :  { %346 = vmatpush1.bf16.msra.mxu0 %v1683_v30 }
  0x3c   :  { %347 = vmatprep.subr.bf16.mxu0 %v1684_v31 }
  0x3f   :  { %348 = vmatpush1.bf16.msra.mxu0 %v1686_v32 }
  0x42   :  { %350 = vmatmul.mubr.bf16.vlgmr.msra.gmra.mrb[0].mxu0 %v1687_v33 }
  0x43   :  { %359 = vmatprep.mubr.bf16.mxu0 %v1690_v34 }
  0x4a   :  { %360 = vmatmul.mubr.bf16.gmra.mrb[4].mxu0 %v1692_v35 }
  0x4b   :  { %369 = vmatprep.mubr.bf16.mxu0 %v1693_v36 }
  0x52   :  { %370 = vmatmul.mubr.bf16.gmra.mrb[8].mxu0 %v1695_v37 }
  0x53   :  { %379 = vmatprep.mubr.bf16.mxu0 %v1696_v38 }
  0x5a   :  { %380 = vmatmul.mubr.bf16.gmra.mrb[12].mxu0 %v1698_v39 }
  0x5b   :  { %389 = vmatprep.mubr.bf16.mxu0 %v1699_v40 }
  0x62   :  { %390 = vmatmul.mubr.bf16.gmra.mrb[16].mxu0 %v1701_v41 }
  0x63   :  { %399 = vmatprep.mubr.bf16.mxu0 %v1702_v42 }
  0x6a   :  { %400 = vmatmul.mubr.bf16.gmra.mrb[20].mxu0 %v1704_v43 }
  0x6b   :  { %409 = vmatprep.mubr.bf16.mxu0 %v1705_v44 }
  0x72   :  { %410 = vmatmul.mubr.bf16.gmra.mrb[24].mxu0 %v1707_v45 }
  0x73   :  { %419 = vmatprep.mubr.bf16.mxu0 %v1708_v46 }
  0x7a   :  { %420 = vmatmul.mubr.bf16.gmra.mrb[28].mxu0 %v1710_v47 }
 0x115   :  { %v351_v49 = vpop.f32.mrb[0].mxu0 }
 0x116   :  { %v2006_v50 = vpop.f32.mrb[1].mxu0 }
 0x117   :  { %462 = vrot.lane.b32.xlu0 %v2006_v50, %s1816_s26  ;;  %v355_v51 = vpop.f32.mrb[2].mxu0 }
 0x118   :  { %v890_v52 = vpack.c.bf16 %v355_v51, %v351_v49  ;;  %v357_v53 = vpop.f32.mrb[3].mxu0 }
 0x11a   :  { %1528 = vmatprep.subr.bf16.mxu1 %v890_v52 }
 0x11b   :  { %1529 = vmatpush3.bf16.msra.mxu1 %v890_v52  ;;  %464 = vrot.lane.b32.xlu0 %v357_v53, %s1816_s26 }
 0x11d   :  { %v361_v54 = vpop.f32.mrb[4].mxu0 }
 0x11e   :  { %v363_v55 = vpop.f32.mrb[5].mxu0 }
 0x11f   :  { %466 = vrot.lane.b32.xlu1 %v363_v55, %s1816_s26  ;;  %v365_v56 = vpop.f32.mrb[6].mxu0 }
 0x120   :  { %v891_v57 = vpack.c.bf16 %v365_v56, %v361_v54  ;;  %v367_v58 = vpop.f32.mrb[7].mxu0  ;;  %v430_v56 = vld [vmem:[%s2522_s5] sm:$0xf] }
 0x121   :  { %vm690_vm0 = vcmp.ne.bf16.partialorder %v430_v56, 0 }
 0x122   :  { %1530 = vmatprep.subr.bf16.mxu1 %v891_v57 }
 0x123   :  { %1531 = vmatpush3.bf16.msra.mxu1 %v891_v57  ;;  %468 = vrot.lane.b32.xlu1 %v367_v58, %s1816_s26  ;;  %v431_v57 = vld [vmem:[%s2522_s5 + $0x4] sm:$0xf] }
 0x124   :  { %vm691_vm1 = vcmp.ne.bf16.partialorder %v431_v57, 0 }
 0x125   :  { %v371_v59 = vpop.f32.mrb[8].mxu0 }
 0x126   :  { %v373_v60 = vpop.f32.mrb[9].mxu0 }
 0x127   :  { %470 = vrot.lane.b32.xlu0 %v373_v60, %s1816_s26  ;;  %v375_v61 = vpop.f32.mrb[10].mxu0 }
 0x128   :  { %v892_v62 = vpack.c.bf16 %v375_v61, %v371_v59  ;;  %v377_v63 = vpop.f32.mrb[11].mxu0  ;;  %v433_v59 = vld [vmem:[%s2522_s5 + $0xc] sm:$0xf]  ;;  %v435_v61 = vld [vmem:[%s2522_s5 + $0x14] sm:$0xf] }
 0x129   :  { %472 = vrot.lane.b32.xlu1 %v377_v63, %s1816_s26  ;;  %vm693_vm3 = vcmp.ne.bf16.partialorder %v433_v59, 0  ;;  %vm695_vm5 = vcmp.ne.bf16.partialorder %v435_v61, 0 }
 0x12a   :  { %1532 = vmatprep.subr.bf16.mxu1 %v892_v62 }
 0x12b   :  { %1533 = vmatpush3.bf16.msra.mxu1 %v892_v62  ;;  %v436_v62 = vld [vmem:[%s2522_s5 + $0x18] sm:$0xf] }
 0x12c   :  { %vm696_vm6 = vcmp.ne.bf16.partialorder %v436_v62, 0 }
 0x12d   :  { %v381_v0 = vpop.f32.mrb[12].mxu0 }
 0x12e   :  { %v383_v1 = vpop.f32.mrb[13].mxu0 }
 0x12f   :  { %474 = vrot.lane.b32.xlu0 %v383_v1, %s1816_s26  ;;  %v385_v2 = vpop.f32.mrb[14].mxu0 }
 0x130   :  { %v893_v3 = vpack.c.bf16 %v385_v2, %v381_v0  ;;  %v387_v4 = vpop.f32.mrb[15].mxu0  ;;  %v438_v0 = vld [vmem:[%s2522_s5 + $0x20] sm:$0xf]  ;;  %v439_v2 = vld [vmem:[%s2522_s5 + $0x24] sm:$0xf] }
 0x131   :  { %476 = vrot.lane.b32.xlu1 %v387_v4, %s1816_s26  ;;  %vm698_vm8 = vcmp.ne.bf16.partialorder %v438_v0, 0  ;;  %vm699_vm9 = vcmp.ne.bf16.partialorder %v439_v2, 0 }
 0x132   :  { %1534 = vmatprep.subr.bf16.mxu1 %v893_v3 }
 0x133   :  { %1535 = vmatpush3.bf16.msra.mxu1 %v893_v3 }
 0x135   :  { %v391_v5 = vpop.f32.mrb[16].mxu0 }
 0x136   :  { %v393_v6 = vpop.f32.mrb[17].mxu0 }
 0x137   :  { %478 = vrot.lane.b32.xlu0 %v393_v6, %s1816_s26  ;;  %v395_v7 = vpop.f32.mrb[18].mxu0 }
 0x138   :  { %v894_v8 = vpack.c.bf16 %v395_v7, %v391_v5  ;;  %v397_v9 = vpop.f32.mrb[19].mxu0  ;;  %v739_v5 = vsel %vm691_vm1, 65537, %v1815_v48  ;;  %v2082_v7 = vsel %vm693_vm3, 65537, %v1815_v48 }
 0x139   :  { %480 = vrot.lane.b32.xlu1 %v397_v9, %s1816_s26 }
 0x13a   :  { %1536 = vmatprep.subr.bf16.mxu1 %v894_v8 }
 0x13b   :  { %1537 = vmatpush3.bf16.msra.mxu1 %v894_v8 }
 0x13d   :  { %v401_v10 = vpop.f32.mrb[20].mxu0 }
 0x13e   :  { %v403_v11 = vpop.f32.mrb[21].mxu0 }
 0x13f   :  { %482 = vrot.lane.b32.xlu0 %v403_v11, %s1816_s26  ;;  %v405_v12 = vpop.f32.mrb[22].mxu0 }
 0x140   :  { %v895_v13 = vpack.c.bf16 %v405_v12, %v401_v10  ;;  %v407_v14 = vpop.f32.mrb[23].mxu0  ;;  %v2091_v10 = vsel %vm696_vm6, 65537, %v1815_v48  ;;  %v2097_v12 = vsel %vm698_vm8, 65537, %v1815_v48 }
 0x141   :  { %484 = vrot.lane.b32.xlu1 %v407_v14, %s1816_s26 }
 0x142   :  { %1538 = vmatprep.subr.bf16.mxu1 %v895_v13 }
 0x143   :  { %1539 = vmatpush3.bf16.msra.mxu1 %v895_v13 }
 0x145   :  { %v411_v15 = vpop.f32.mrb[24].mxu0 }
 0x146   :  { %v413_v16 = vpop.f32.mrb[25].mxu0 }
 0x147   :  { %486 = vrot.lane.b32.xlu0 %v413_v16, %s1816_s26  ;;  %v415_v17 = vpop.f32.mrb[26].mxu0 }
 0x148   :  { %v896_v18 = vpack.c.bf16 %v415_v17, %v411_v15  ;;  %v417_v19 = vpop.f32.mrb[27].mxu0  ;;  %v755_v15 = vunpack.c.l.b16 %v739_v5  ;;  %v443_v5 = vld [vmem:[%s2522_s5 + $0x34] sm:$0xf] }
 0x149   :  { %488 = vrot.lane.b32.xlu1 %v417_v19, %s1816_s26 }
 0x14a   :  { %1540 = vmatprep.subr.bf16.mxu1 %v896_v18  ;;  %vm2127_vm1 = vcmp.ne.s32.totalorder %v755_v15, 0 }
 0x14b   :  { %1541 = vmatpush3.bf16.msra.mxu1 %v896_v18 }
 0x14d   :  { %547 = vperm.xlu1 %1638, %v357_v53   ;;  %v421_v20 = vpop.f32.mrb[28].mxu0  ;;  %v606_v53 = vlaneseq }
 0x14e   :  { %v423_v21 = vpop.f32.mrb[29].mxu0 }
 0x14f   :  { %490 = vrot.lane.b32.xlu0 %v423_v21, %s1816_s26  ;;  %v425_v22 = vpop.f32.mrb[30].mxu0 }
 0x150   :  { %v897_v23 = vpack.c.bf16 %v425_v22, %v421_v20  ;;  %v427_v24 = vpop.f32.mrb[31].mxu0  ;;  %v760_v22 = vunpack.c.l.b16 %v2091_v10 }
 0x151   :  { %551 = vperm.xlu1 %1638, %v363_v55   ;;  %v607_v55 = vshrl.u32 %v606_v53, 7 }
 0x152   :  { %1542 = vmatprep.subr.bf16.mxu1 %v897_v23 }
 0x153   :  { %543 = vperm.xlu0 %1637, %v2006_v50   ;;  %1543 = vmatpush3.bf16.msra.mxu1 %v897_v23  ;;  %v1270_v50 = vld [vmem:[%s2521_s1] sm:$0xff]  ;;  %v608_v3 = vsub.s32 0, %v607_v55 }
 0x154   :  { %v1271_v51 = vadd.s32 64, %v1270_v50 }
 0x155   :  { %559 = vperm.xlu1 %1638, %v373_v60   ;;  %v434_v60 = vld [vmem:[%s2522_s5 + $0x10] sm:$0xf] }
 0x156   :  { %vm694_vm4 = vcmp.ne.bf16.partialorder %v434_v60, 0  ;;  %v2135_v60 = vld [vmem:[%s2522_s5 + $0x28] sm:$0xf] }
 0x157   :  { %555 = vperm.xlu0 %1637, %v367_v58   ;;  %v432_v58 = vld [vmem:[%s2522_s5 + $0x8] sm:$0xf]  ;;  %v2085_v8 = vsel %vm694_vm4, 65537, %v1815_v48  ;;  %vm700_vm4 = vcmp.ne.bf16.partialorder %v2135_v60, 0 }
 0x158   :  { %vm692_vm2 = vcmp.ne.bf16.partialorder %v432_v58, 0  ;;  %v758_v20 = vunpack.c.l.b16 %v2085_v8 }
 0x159   :  { %567 = vperm.xlu1 %1638, %v383_v1  }
 0x15b   :  { %563 = vperm.xlu0 %1637, %v377_v63   ;;  %v437_v63 = vld [vmem:[%s2522_s5 + $0x1c] sm:$0xf] }
 0x15c   :  { %vm697_vm7 = vcmp.ne.bf16.partialorder %v437_v63, 0 }
 0x15d   :  { %575 = vperm.xlu1 %1638, %v393_v6   ;;  %v2079_v6 = vsel %vm692_vm2, 65537, %v1815_v48 }
 0x15f   :  { %571 = vperm.xlu0 %1637, %v387_v4   ;;  %v738_v4 = vsel %vm690_vm0, 65537, %v1815_v48 }
 0x161   :  { %583 = vperm.xlu1 %1638, %v403_v11   ;;  %v2094_v11 = vsel %vm697_vm7, 65537, %v1815_v48 }
 0x162   :  { %v761_v23 = vunpack.c.l.b16 %v2094_v11 }
 0x163   :  { %579 = vperm.xlu0 %1637, %v397_v9   ;;  %v2088_v9 = vsel %vm695_vm5, 65537, %v1815_v48 }
 0x165   :  { %591 = vperm.xlu1 %1638, %v413_v16   ;;  %v756_v16 = vunpack.c.l.b16 %v2079_v6 }
 0x167   :  { %587 = vperm.xlu0 %1637, %v407_v14   ;;  %v754_v14 = vunpack.c.l.b16 %v738_v4  ;;  %vm2140_vm5 = vcmp.ne.s32.totalorder %v756_v16, 0 }
 0x169   :  { %599 = vperm.xlu1 %1638, %v423_v21   ;;  %v759_v21 = vunpack.c.l.b16 %v2088_v9  ;;  %vm2123_vm0 = vcmp.ne.s32.totalorder %v754_v14, 0  ;;  %v441_v9 = vld [vmem:[%s2522_s5 + $0x2c] sm:$0xf] }
 0x16b   :  { %595 = vperm.xlu0 %1637, %v417_v19   ;;  %v757_v19 = vunpack.c.l.b16 %v2082_v7 }
 0x16d   :  { %492 = vrot.lane.b32.xlu1 %v427_v24, %s1816_s26  ;;  %vm2144_vm6 = vcmp.ne.s32.totalorder %v757_v19, 0 }
 0x16f   :  { %603 = vperm.xlu0 %1637, %v427_v24   ;;  %v2108_v24 = vsel %vm699_vm9, 65537, %v1815_v48  ;;  %vm2158_vm9 = vcmp.ne.s32.totalorder %v758_v20, 0 }
 0x189   :  { %v463_v25 = vpop.permute.xlu0 %462 }
 0x18d   :  { %v465_v26 = vpop.permute.xlu0 %464 }
 0x191   :  { %v467_v27 = vpop.permute.xlu1 %466 }
 0x195   :  { %v469_v28 = vpop.permute.xlu1 %468 }
 0x196   :  { %510 = vxpose.xlu1.b32.start [1/16] (narrow) %v463_v25, 8  ;;  %v762_v25 = vunpack.c.l.b16 %v2097_v12 }
 0x199   :  { %v471_v29 = vpop.permute.xlu0 %470 }
 0x19a   :  { %511 = vxpose.xlu1.b32.cont [2/16] (narrow) %v465_v26, 8 }
 0x19b   :  { %v473_v30 = vpop.permute.xlu1 %472 }
 0x19e   :  { %512 = vxpose.xlu1.b32.cont [3/16] (narrow) %v467_v27, 8 }
 0x1a1   :  { %v475_v31 = vpop.permute.xlu0 %474 }
 0x1a2   :  { %513 = vxpose.xlu1.b32.cont [4/16] (narrow) %v469_v28, 8 }
 0x1a3   :  { %v477_v32 = vpop.permute.xlu1 %476 }
 0x1a6   :  { %514 = vxpose.xlu1.b32.cont [5/16] (narrow) %v471_v29, 8 }
 0x1a9   :  { %v479_v33 = vpop.permute.xlu0 %478 }
 0x1aa   :  { %515 = vxpose.xlu1.b32.cont [6/16] (narrow) %v473_v30, 8 }
 0x1ab   :  { %v481_v34 = vpop.permute.xlu1 %480 }
 0x1ae   :  { %516 = vxpose.xlu1.b32.cont [7/16] (narrow) %v475_v31, 8 }
 0x1b1   :  { %v483_v35 = vpop.permute.xlu0 %482 }
 0x1b2   :  { %517 = vxpose.xlu1.b32.cont [8/16] (narrow) %v477_v32, 8 }
 0x1b3   :  { %v485_v36 = vpop.permute.xlu1 %484 }
 0x1b6   :  { %518 = vxpose.xlu1.b32.cont [9/16] (narrow) %v479_v33, 8 }
 0x1b9   :  { %v487_v37 = vpop.permute.xlu0 %486 }
 0x1ba   :  { %519 = vxpose.xlu1.b32.cont [10/16] (narrow) %v481_v34, 8 }
 0x1bb   :  { %v489_v38 = vpop.permute.xlu1 %488 }
 0x1be   :  { %520 = vxpose.xlu1.b32.cont [11/16] (narrow) %v483_v35, 8 }
 0x1c1   :  { %v491_v40 = vpop.permute.xlu0 %490 }
 0x1c2   :  { %521 = vxpose.xlu1.b32.cont [12/16] (narrow) %v485_v36, 8 }
 0x1c6   :  { %522 = vxpose.xlu1.b32.cont [13/16] (narrow) %v487_v37, 8 }
 0x1ca   :  { %523 = vxpose.xlu1.b32.cont [14/16] (narrow) %v489_v38, 8 }
 0x1cc   :  { %v2026_v39 = vpop.permute.xlu1 %547 }
 0x1ce   :  { %524 = vxpose.xlu1.b32.cont [15/16] (narrow) %v491_v40, 8 }
 0x1d0   :  { %v2028_v41 = vpop.permute.xlu1 %551 }
 0x1d2   :  { %v544_v52 = vpop.permute.xlu0 %543 }
 0x1d4   :  { %v2030_v42 = vpop.permute.xlu1 %559 }
 0x1d6   :  { %v556_v54 = vpop.permute.xlu0 %555 }
 0x1d8   :  { %v2032_v43 = vpop.permute.xlu1 %567 }
 0x1da   :  { %v564_v1 = vpop.permute.xlu0 %563 }
 0x1dc   :  { %v2034_v44 = vpop.permute.xlu1 %575 }
 0x1de   :  { %v572_v17 = vpop.permute.xlu0 %571 }
 0x1e0   :  { %v2036_v45 = vpop.permute.xlu1 %583 }
 0x1e2   :  { %v580_v38 = vpop.permute.xlu0 %579 }
 0x1e4   :  { %v2038_v46 = vpop.permute.xlu1 %591 }
 0x1e8   :  { %v2040_v47 = vpop.permute.xlu1 %599 }
 0x1ec   :  { %v493_v49 = vpop.permute.xlu1 %492 }
 0x1ed   :  { %525 = vxpose.xlu1.b32.end [16/16] (narrow) %v493_v49, 8 }
 0x20b   :  { %1273 = vperm.xlu1 %1638, %v1271_v51  }
 0x231   :  { %v526_v13 = vpop.trf.xlu1 }
 0x232   :  { %v2100_v18 = vrot.slane %v526_v13, %v608_v3 }
 0x234   :  { %v610_v26 = vadd.f32 %v2100_v18, %v544_v52  ;;  %v611_v27 = vadd.f32 %v2100_v18, %v2026_v39  ;;  %v612_v28 = vadd.f32 %v2100_v18, %v2028_v41  ;;  %v613_v29 = vadd.f32 %v2100_v18, %v556_v54 }
 0x235   :  { %v614_v30 = vadd.f32 %v2100_v18, %v2030_v42  ;;  %v615_v31 = vadd.f32 %v2100_v18, %v564_v1  ;;  %v616_v32 = vadd.f32 %v2100_v18, %v2032_v43  ;;  %v617_v33 = vadd.f32 %v2100_v18, %v572_v17  ;;  %v588_v1 = vpop.permute.xlu0 %587 }
 0x236   :  { %vm626_vm10 = vcmp.gt.f32.partialorder %v610_v26, 0.0  ;;  %v642_v34 = vsub.f32 0.0, %v610_v26  ;;  %v658_v35 = vmul.f32 -0.2, %v610_v26  ;;  %vm627_vm11 = vcmp.gt.f32.partialorder %v611_v27, 0.0 }
 0x237   :  { %v643_v36 = vsub.f32 0.0, %v611_v27  ;;  %v659_v37 = vmul.f32 -0.2, %v611_v27  ;;  %vm628_vm12 = vcmp.gt.f32.partialorder %v612_v28, 0.0  ;;  %vm629_vm13 = vcmp.gt.f32.partialorder %v613_v29, 0.0 }
 0x238   :  { %v674_v39 = vsel %vm626_vm10, %v642_v34, %v658_v35  ;;  %v644_v40 = vsub.f32 0.0, %v612_v28  ;;  %v645_v41 = vsub.f32 0.0, %v613_v29  ;;  %v660_v42 = vmul.f32 -0.2, %v612_v28 }
 0x239   :  { %v706_v49 = vmul.f32 1.442695, %v674_v39  ;;  %v675_v50 = vsel %vm627_vm11, %v643_v36, %v659_v37  ;;  %v661_v51 = vmul.f32 -0.2, %v613_v29  ;;  %vm630_vm14 = vcmp.gt.f32.partialorder %v614_v30, 0.0 }
 0x23a   :  { %v708_v43 = vmul.f32 1.442695, %v675_v50  ;;  %v676_v52 = vsel %vm628_vm12, %v644_v40, %v660_v42  ;;  %vm631_vm15 = vcmp.gt.f32.partialorder %v615_v31, 0.0  ;;  %v646_v54 = vsub.f32 0.0, %v614_v30 }
 0x23b   :  { %1719 = vpow2.f32 %v706_v49  ;;  %v677_v57 = vsel %vm629_vm13, %v645_v41, %v661_v51  ;;  %v710_v58 = vmul.f32 1.442695, %v676_v52  ;;  %v647_v59 = vsub.f32 0.0, %v615_v31  ;;  %vm1424_vm13 = vmpackc.low %vm2127_vm1, %vm2123_vm0 }
 0x23c   :  { %1721 = vpow2.f32 %v708_v43  ;;  %v712_v61 = vmul.f32 1.442695, %v677_v57  ;;  %v662_v62 = vmul.f32 -0.2, %v614_v30  ;;  %v663_v63 = vmul.f32 -0.2, %v615_v31 }
 0x23d   :  { %1723 = vpow2.f32 %v710_v58  ;;  %vm632_vm2 = vcmp.gt.f32.partialorder %v616_v32, 0.0  ;;  %vm633_vm3 = vcmp.gt.f32.partialorder %v617_v33, 0.0  ;;  %v648_v0 = vsub.f32 0.0, %v616_v32 }
 0x23e   :  { %1725 = vpow2.f32 %v712_v61  ;;  %v678_v2 = vsel %vm630_vm14, %v646_v54, %v662_v62  ;;  %v679_v3 = vsel %vm631_vm15, %v647_v59, %v663_v63  ;;  %v649_v4 = vsub.f32 0.0, %v617_v33 }
 0x23f   :  { %v714_v7 = vmul.f32 1.442695, %v678_v2  ;;  %v716_v13 = vmul.f32 1.442695, %v679_v3  ;;  %v664_v14 = vmul.f32 -0.2, %v616_v32  ;;  %v618_v15 = vadd.f32 %v2100_v18, %v2034_v44 }
 0x240   :  { %v665_v17 = vmul.f32 -0.2, %v617_v33  ;;  %v619_v26 = vadd.f32 %v2100_v18, %v580_v38  ;;  %v620_v27 = vadd.f32 %v2100_v18, %v2036_v45  ;;  %v621_v16 = vadd.f32 %v2100_v18, %v588_v1  ;;  %v596_v33 = vpop.permute.xlu0 %595 }
 0x241   :  { %1727 = vpow2.f32 %v714_v7  ;;  %v680_v19 = vsel %vm632_vm2, %v648_v0, %v664_v14  ;;  %vm634_vm7 = vcmp.gt.f32.partialorder %v618_v15, 0.0  ;;  %v650_v28 = vsub.f32 0.0, %v618_v15  ;;  %vm1427_vm2 = vmpackc.low %vm2144_vm6, %vm2140_vm5 }
 0x242   :  { %1729 = vpow2.f32 %v716_v13  ;;  %v681_v29 = vsel %vm633_vm3, %v649_v4, %v665_v17  ;;  %v718_v30 = vmul.f32 1.442695, %v680_v19  ;;  %vm635_vm8 = vcmp.gt.f32.partialorder %v619_v26, 0.0  ;;  %v442_v13 = vld [vmem:[%s2522_s5 + $0x30] sm:$0xf] }
 0x243   :  { %vm2164_vm10 = vcmp.ne.s32.totalorder %v759_v21, 0  ;;  %v720_v31 = vmul.f32 1.442695, %v681_v29  ;;  %v651_v32 = vsub.f32 0.0, %v619_v26  ;;  %v666_v34 = vmul.f32 -0.2, %v618_v15 }
 0x244   :  { %vm636_vm11 = vcmp.gt.f32.partialorder %v620_v27, 0.0  ;;  %1731 = vpow2.f32 %v718_v30  ;;  %v667_v35 = vmul.f32 -0.2, %v619_v26  ;;  %vm637_vm12 = vcmp.gt.f32.partialorder %v621_v16, 0.0  ;;  %v604_v59 = vpop.permute.xlu0 %603 }
 0x245   :  { %v652_v36 = vsub.f32 0.0, %v620_v27  ;;  %v1720_v8 = vpop.eup %1719  ;;  %1733 = vpow2.f32 %v720_v31  ;;  %v682_v20 = vsel %vm634_vm7, %v650_v28, %v666_v34  ;;  %v653_v21 = vsub.f32 0.0, %v621_v16 }
 0x246   :  { %v668_v37 = vmul.f32 -0.2, %v620_v27  ;;  %v1722_v38 = vpop.eup %1721  ;;  %v786_v39 = vsel %vm2123_vm0, %v1720_v8, 0.0  ;;  %v683_v40 = vsel %vm635_vm8, %v651_v32, %v667_v35  ;;  %v722_v41 = vmul.f32 1.442695, %v682_v20 }
 0x247   :  { %v669_v42 = vmul.f32 -0.2, %v621_v16  ;;  %v1724_v49 = vpop.eup %1723  ;;  %802 = vadd.xlane.f32.xlu0 %v786_v39  ;;  %v1425_v50 = vpack.c.bf16 %v1722_v38, %v1720_v8  ;;  %vm2181_vm14 = vcmp.ne.s32.totalorder %v760_v22, 0  ;;  %vm2187_vm15 = vcmp.ne.s32.totalorder %v761_v23, 0  ;;  %v445_v35 = vld [vmem:[%s2522_s5 + $0x3c] sm:$0xf] }
 0x248   :  { %v724_v52 = vmul.f32 1.442695, %v683_v40  ;;  %v763_v54 = vunpack.c.l.b16 %v2108_v24  ;;  %v684_v57 = vsel %vm636_vm11, %v652_v36, %v668_v37  ;;  %v2193_v58 = vpop.eup %1725  ;;  %1735 = vpow2.f32 %v722_v41 }
 0x249   :  { %v685_v10 = vsel %vm637_vm12, %v653_v21, %v669_v42  ;;  %vm701_vm3 = vcmp.ne.bf16.partialorder %v441_v9, 0  ;;  %v726_v11 = vmul.f32 1.442695, %v684_v57  ;;  %1544 = vmatprep.mubr.msk.bf16.mxu1 %vm1424_vm13, %v1425_v50  ;;  %v1428_v22 = vpack.c.bf16 %v2193_v58, %v1724_v49  ;;  %vm1433_vm12 = vmpackc.low %vm2187_vm15, %vm2181_vm14 }
 0x24a   :  { %1737 = vpow2.f32 %v724_v52  ;;  %v728_v23 = vmul.f32 1.442695, %v685_v10  ;;  %v2209_v24 = vsel %vm700_vm4, 65537, %v1815_v48  ;;  %v787_v61 = vsel %vm2127_vm1, %v1722_v38, 0.0  ;;  %vm1430_vm1 = vmpackc.low %vm2164_vm10, %vm2158_vm9 }
 0x24b   :  { %v622_v62 = vadd.f32 %v2100_v18, %v2038_v46  ;;  %v623_v55 = vadd.f32 %v2100_v18, %v596_v33  ;;  %v624_v63 = vadd.f32 %v2100_v18, %v2040_v47  ;;  %v2218_v0 = vpop.eup %1727  ;;  %1545 = vmatmul.mubr.msk.bf16.vlgmr.msra.gmra.mrb[0].mxu1 %vm1427_vm2, %v1428_v22  ;;  %804 = vadd.xlane.f32.xlu0 %v787_v61  ;;  %vm2227_vm0 = vcmp.ne.s32.totalorder %v762_v25, 0  ;;  %v444_v33 = vld [vmem:[%s2522_s5 + $0x38] sm:$0xf] }
 0x24c   :  { %1739 = vpow2.f32 %v726_v11  ;;  %v2233_v46 = vsel %vm701_vm3, 65537, %v1815_v48  ;;  %v625_v47 = vadd.f32 %v2100_v18, %v604_v59  ;;  %v2236_v60 = vpop.eup %1729  ;;  %v788_v18 = vsel %vm2140_vm5, %v1724_v49, 0.0 }
 0x24d   :  { %1741 = vpow2.f32 %v728_v23  ;;  %vm638_vm4 = vcmp.gt.f32.partialorder %v622_v62, 0.0  ;;  %vm639_vm7 = vcmp.gt.f32.partialorder %v623_v55, 0.0  ;;  %v654_v12 = vsub.f32 0.0, %v622_v62 }
 0x24e   :  { %v1431_v25 = vpack.c.bf16 %v2236_v60, %v2218_v0  ;;  %v655_v1 = vsub.f32 0.0, %v623_v55  ;;  %v670_v2 = vmul.f32 -0.2, %v622_v62  ;;  %v671_v3 = vmul.f32 -0.2, %v623_v55  ;;  %v2244_v4 = vpop.eup %1731 }
 0x24f   :  { %vm2248_vm8 = vcmp.ne.s32.totalorder %v763_v54, 0  ;;  %vm640_vm11 = vcmp.gt.f32.partialorder %v624_v63, 0.0  ;;  %v656_v14 = vsub.f32 0.0, %v624_v63  ;;  %v2255_v15 = vpop.eup %1733  ;;  %806 = vadd.xlane.f32.xlu0 %v788_v18  ;;  %vm641_vm5 = vcmp.gt.f32.partialorder %v625_v47, 0.0  ;;  %v1711_v18 = vld [vmem:[%s2524_s6] sm:$0xff]  }
 0x250   :  { %1548 = vmatprep.mubr.msk.bf16.mxu1 %vm1430_vm1, %v1431_v25  ;;  %v686_v17 = vsel %vm638_vm4, %v654_v12, %v670_v2  ;;  %v687_v26 = vsel %vm639_vm7, %v655_v1, %v671_v3  ;;  %v657_v27 = vsub.f32 0.0, %v625_v47  ;;  %v672_v28 = vmul.f32 -0.2, %v624_v63  ;;  %v1262_v3 = vld [vmem:[%s2523_s0] sm:$0xff] }
 0x251   :  { %v730_v16 = vmul.f32 1.442695, %v686_v17  ;;  %v732_v19 = vmul.f32 1.442695, %v687_v26  ;;  %v1434_v29 = vpack.c.bf16 %v2255_v15, %v2244_v4  ;;  %v764_v30 = vunpack.c.l.b16 %v2209_v24 }
 0x252   :  { %vm702_vm13 = vcmp.ne.bf16.partialorder %v442_v13, 0  ;;  %v673_v31 = vmul.f32 -0.2, %v625_v47  ;;  %v1736_v32 = vpop.eup %1735  ;;  %v789_v34 = vsel %vm2144_vm6, %v2193_v58, 0.0  ;;  %vm703_vm2 = vcmp.ne.bf16.partialorder %v443_v5, 0  ;;  %vm1436_vm6 = vmpackc.low %vm2248_vm8, %vm2227_vm0 }
 0x253   :  { %1743 = vpow2.f32 %v730_v16  ;;  %v688_v36 = vsel %vm640_vm11, %v656_v14, %v672_v28  ;;  %1549 = vmatmul.mubr.msk.bf16.gmra.mrb[4].mxu1 %vm1433_vm12, %v1434_v29  ;;  %808 = vadd.xlane.f32.xlu0 %v789_v34  ;;  %v765_v6 = vunpack.c.l.b16 %v2233_v46  ;;  %v750_v37 = vsel %vm702_vm13, 65537, %v1815_v48 }
 0x254   :  { %v1738_v8 = vpop.eup %1737  ;;  %1745 = vpow2.f32 %v732_v19  ;;  %v689_v20 = vsel %vm641_vm5, %v657_v27, %v673_v31  ;;  %v734_v9 = vmul.f32 1.442695, %v688_v36  ;;  %v751_v40 = vsel %vm703_vm2, 65537, %v1815_v48 }
 0x255   :  { %v1437_v21 = vpack.c.bf16 %v1738_v8, %v1736_v32  ;;  %v736_v38 = vmul.f32 1.442695, %v689_v20  ;;  %vm704_vm3 = vcmp.ne.bf16.partialorder %v444_v33, 0  ;;  %vm705_vm1 = vcmp.ne.bf16.partialorder %v445_v35, 0 }
 0x256   :  { %v1740_v39 = vpop.eup %1739  ;;  %1747 = vpow2.f32 %v734_v9  ;;  %v790_v42 = vsel %vm2158_vm9, %v2218_v0, 0.0  ;;  %vm2302_vm4 = vcmp.ne.s32.totalorder %v764_v30, 0  ;;  %vm2306_vm7 = vcmp.ne.s32.totalorder %v765_v6, 0 }
 0x257   :  { %v1742_v41 = vpop.eup %1741  ;;  %1552 = vmatprep.mubr.msk.bf16.mxu1 %vm1436_vm6, %v1437_v21  ;;  %1749 = vpow2.f32 %v736_v38  ;;  %810 = vadd.xlane.f32.xlu0 %v790_v42  ;;  %vm1439_vm11 = vmpackc.low %vm2306_vm7, %vm2302_vm4  ;;  %v766_v52 = vunpack.c.l.b16 %v750_v37  ;;  %v767_v54 = vunpack.c.l.b16 %v751_v40  ;;  %v752_v44 = vsel %vm704_vm3, 65537, %v1815_v48 }
 0x258   :  { %v753_v57 = vsel %vm705_vm1, 65537, %v1815_v48  ;;  %v1440_v58 = vpack.c.bf16 %v1742_v41, %v1740_v39  ;;  %v791_v10 = vsel %vm2164_vm10, %v2236_v60, 0.0  ;;  %v768_v11 = vunpack.c.l.b16 %v752_v44 }
 0x259   :  { %v769_v22 = vunpack.c.l.b16 %v753_v57  ;;  %vm2319_vm9 = vcmp.ne.s32.totalorder %v766_v52, 0  ;;  %vm2323_vm5 = vcmp.ne.s32.totalorder %v767_v54, 0  ;;  %v792_v45 = vsel %vm2181_vm14, %v2244_v4, 0.0 }
 0x25a   :  { %vm1442_vm12 = vmpackc.low %vm2323_vm5, %vm2319_vm9  ;;  %vm2334_vm10 = vcmp.ne.s32.totalorder %v768_v11, 0  ;;  %v793_v51 = vsel %vm2187_vm15, %v2255_v15, 0.0  ;;  %v794_v47 = vsel %vm2227_vm0, %v1736_v32, 0.0  ;;  %v795_v60 = vsel %vm2248_vm8, %v1738_v8, 0.0 }
 0x25b   :  { %1553 = vmatmul.mubr.msk.bf16.gmra.mrb[8].mxu1 %vm1439_vm11, %v1440_v58  ;;  %812 = vadd.xlane.f32.xlu0 %v791_v10  ;;  %vm2338_vm13 = vcmp.ne.s32.totalorder %v769_v22, 0  ;;  %v796_v12 = vsel %vm2302_vm4, %v1740_v39, 0.0  ;;  %v797_v25 = vsel %vm2306_vm7, %v1742_v41, 0.0 }
 0x25c   :  { %vm1445_vm2 = vmpackc.low %vm2338_vm13, %vm2334_vm10 }
 0x25d   :  { %v1744_v23 = vpop.eup %1743 }
 0x25e   :  { %v1746_v61 = vpop.eup %1745  ;;  %v798_v43 = vsel %vm2319_vm9, %v1744_v23, 0.0 }
 0x25f   :  { %v1443_v48 = vpack.c.bf16 %v1746_v61, %v1744_v23  ;;  %814 = vadd.xlane.f32.xlu0 %v792_v45  ;;  %v799_v56 = vsel %vm2323_vm5, %v1746_v61, 0.0 }
 0x260   :  { %v1748_v62 = vpop.eup %1747 }
 0x261   :  { %v1750_v0 = vpop.eup %1749  ;;  %1556 = vmatprep.mubr.msk.bf16.mxu1 %vm1442_vm12, %v1443_v48  ;;  %v800_v1 = vsel %vm2334_vm10, %v1748_v62, 0.0 }
 0x262   :  { %v1446_v46 = vpack.c.bf16 %v1750_v0, %v1748_v62  ;;  %v801_v2 = vsel %vm2338_vm13, %v1750_v0, 0.0 }
 0x263   :  { %816 = vadd.xlane.f32.xlu0 %v793_v51 }
 0x264   :  { %1557 = vmatmul.mubr.msk.bf16.gmra.mrb[12].mxu1 %vm1445_vm2, %v1446_v46 }
 0x265   :  { %1576 = vmatprep.mubr.bf16.mxu1 %v1711_v18 }
 0x267   :  { %818 = vadd.xlane.f32.xlu0 %v794_v47 }
 0x26b   :  { %820 = vadd.xlane.f32.xlu0 %v795_v60 }
 0x26f   :  { %822 = vadd.xlane.f32.xlu0 %v796_v12 }
 0x273   :  { %824 = vadd.xlane.f32.xlu0 %v797_v25 }
 0x277   :  { %826 = vadd.xlane.f32.xlu0 %v798_v43 }
 0x27b   :  { %828 = vadd.xlane.f32.xlu0 %v799_v56 }
 0x27f   :  { %830 = vadd.xlane.f32.xlu0 %v800_v1 }
 0x283   :  { %832 = vadd.xlane.f32.xlu0 %v801_v2 }
 0x299   :  { %1264 = vperm.xlu0 %1637, %v1262_v3  }
 0x2d4   :  { %v803_v4 = vpop.xlane.xlu0 %802 }
 0x2d5   :  { %vm834_vm15 = vcmp.gt.f32.partialorder %v803_v4, 0.0 }
 0x2d8   :  { %v805_v7 = vpop.xlane.xlu0 %804 }
 0x2d9   :  { %vm835_vm8 = vcmp.gt.f32.partialorder %v805_v7, 0.0 }
 0x2dc   :  { %v807_v13 = vpop.xlane.xlu0 %806 }
 0x2dd   :  { %1751 = vrcp.f32 %v807_v13  ;;  %vm836_vm14 = vcmp.gt.f32.partialorder %v807_v13, 0.0 }
 0x2de   :  { %1753 = vrcp.f32 %v803_v4 }
 0x2e0   :  { %v809_v14 = vpop.xlane.xlu0 %808 }
 0x2e1   :  { %1755 = vrcp.f32 %v809_v14  ;;  %vm837_vm0 = vcmp.gt.f32.partialorder %v809_v14, 0.0 }
 0x2e2   :  { %1757 = vrcp.f32 %v805_v7 }
 0x2e4   :  { %v2371_v15 = vpop.xlane.xlu0 %810 }
 0x2e5   :  { %vm838_vm3 = vcmp.gt.f32.partialorder %v2371_v15, 0.0 }
 0x2e7   :  { %v1752_v30 = vpop.eup %1751 }
 0x2e8   :  { %v2373_v5 = vpop.xlane.xlu0 %812  ;;  %v1754_v32 = vpop.eup %1753  ;;  %v868_v35 = vsel %vm836_vm14, %v1752_v30, 0.0 }
 0x2e9   :  { %v866_v6 = vsel %vm834_vm15, %v1754_v32, 0.0  ;;  %vm839_vm4 = vcmp.gt.f32.partialorder %v2373_v5, 0.0 }
 0x2eb   :  { %v1756_v34 = vpop.eup %1755 }
 0x2ec   :  { %v815_v17 = vpop.xlane.xlu0 %814  ;;  %v1758_v33 = vpop.eup %1757  ;;  %v869_v21 = vsel %vm837_vm0, %v1756_v34, 0.0 }
 0x2ed   :  { %1759 = vrcp.f32 %v815_v17  ;;  %v867_v41 = vsel %vm835_vm8, %v1758_v33, 0.0  ;;  %vm840_vm6 = vcmp.gt.f32.partialorder %v815_v17, 0.0 }
 0x2ee   :  { %1761 = vrcp.f32 %v2371_v15 }
 0x2f0   :  { %v2375_v26 = vpop.xlane.xlu0 %816 }
 0x2f1   :  { %1763 = vrcp.f32 %v2375_v26  ;;  %vm841_vm1 = vcmp.gt.f32.partialorder %v2375_v26, 0.0 }
 0x2f2   :  { %1765 = vrcp.f32 %v2373_v5 }
 0x2f4   :  { %v2377_v27 = vpop.xlane.xlu0 %818 }
 0x2f5   :  { %1767 = vrcp.f32 %v2377_v27  ;;  %vm842_vm7 = vcmp.gt.f32.partialorder %v2377_v27, 0.0 }
 0x2f7   :  { %v1760_v52 = vpop.eup %1759 }
 0x2f8   :  { %v2379_v16 = vpop.xlane.xlu0 %820  ;;  %v1762_v44 = vpop.eup %1761  ;;  %v872_v11 = vsel %vm840_vm6, %v1760_v52, 0.0 }
 0x2f9   :  { %1769 = vrcp.f32 %v2379_v16  ;;  %v870_v59 = vsel %vm838_vm3, %v1762_v44, 0.0  ;;  %vm843_vm11 = vcmp.gt.f32.partialorder %v2379_v16, 0.0 }
 0x2fb   :  { %v1764_v58 = vpop.eup %1763 }
 0x2fc   :  { %v2381_v19 = vpop.xlane.xlu0 %822  ;;  %v1766_v10 = vpop.eup %1765  ;;  %v873_v45 = vsel %vm841_vm1, %v1764_v58, 0.0 }
 0x2fd   :  { %1771 = vrcp.f32 %v2381_v19  ;;  %v871_v46 = vsel %vm839_vm4, %v1766_v10, 0.0  ;;  %vm844_vm9 = vcmp.gt.f32.partialorder %v2381_v19, 0.0 }
 0x2ff   :  { %v1768_v55 = vpop.eup %1767 }
 0x300   :  { %v2383_v28 = vpop.xlane.xlu0 %824  ;;  %v874_v3 = vsel %vm842_vm7, %v1768_v55, 0.0 }
 0x301   :  { %1773 = vrcp.f32 %v2383_v28  ;;  %vm845_vm5 = vcmp.gt.f32.partialorder %v2383_v28, 0.0 }
 0x303   :  { %v1770_v47 = vpop.eup %1769 }
 0x304   :  { %v2385_v29 = vpop.xlane.xlu0 %826  ;;  %v875_v13 = vsel %vm843_vm11, %v1770_v47, 0.0 }
 0x305   :  { %vm846_vm12 = vcmp.gt.f32.partialorder %v2385_v29, 0.0 }
 0x307   :  { %v1772_v25 = vpop.eup %1771 }
 0x308   :  { %v2389_v31 = vpop.xlane.xlu0 %828  ;;  %v876_v18 = vsel %vm844_vm9, %v1772_v25, 0.0 }
 0x309   :  { %vm847_vm10 = vcmp.gt.f32.partialorder %v2389_v31, 0.0 }
 0x30b   :  { %v1774_v56 = vpop.eup %1773 }
 0x30c   :  { %v2399_v38 = vpop.xlane.xlu0 %830  ;;  %v877_v19 = vsel %vm845_vm5, %v1774_v56, 0.0 }
 0x30d   :  { %vm848_vm0 = vcmp.gt.f32.partialorder %v2399_v38, 0.0 }
 0x310   :  { %v2413_v23 = vpop.xlane.xlu0 %832 }
 0x311   :  { %vm849_vm8 = vcmp.gt.f32.partialorder %v2413_v23, 0.0 }
 0x31e   :  { %v1546_v36 = vpop.f32.mrb[0].mxu1 }
 0x31f   :  { %v2393_v8 = vmul.f32 %v1546_v36, %v868_v35  ;;  %v932_v20 = vpop.f32.mrb[1].mxu1 }
 0x320   :  { %v2396_v9 = vmul.f32 %v932_v20, %v866_v6  ;;  %v1547_v37 = vpop.f32.mrb[2].mxu1 }
 0x321   :  { %v1031_v39 = vmul.f32 1.442695, %v2393_v8  ;;  %v2402_v40 = vmul.f32 %v1547_v37, %v869_v21  ;;  %v935_v42 = vpop.f32.mrb[3].mxu1  ;;  %vm1013_vm13 = vcmp.gt.f32.partialorder %v2393_v8, 0.0 }
 0x322   :  { %v1027_v49 = vmul.f32 1.442695, %v2396_v9  ;;  %v2406_v50 = vmul.f32 %v935_v42, %v867_v41  ;;  %vm1011_vm2 = vcmp.gt.f32.partialorder %v2396_v9, 0.0 }
 0x323   :  { %1775 = vpow2.f32 %v1031_v39  ;;  %v1033_v54 = vmul.f32 1.442695, %v2402_v40  ;;  %vm1014_vm15 = vcmp.gt.f32.partialorder %v2402_v40, 0.0 }
 0x324   :  { %1777 = vpow2.f32 %v1027_v49  ;;  %v1029_v57 = vmul.f32 1.442695, %v2406_v50  ;;  %vm1012_vm14 = vcmp.gt.f32.partialorder %v2406_v50, 0.0 }
 0x325   :  { %1779 = vpow2.f32 %v1033_v54 }
 0x326   :  { %1781 = vpow2.f32 %v1029_v57  ;;  %v1550_v22 = vpop.f32.mrb[4].mxu1 }
 0x327   :  { %1783 = vrcp.f32 %v2385_v29  ;;  %v2415_v24 = vmul.f32 %v1550_v22, %v872_v11  ;;  %v948_v61 = vpop.f32.mrb[5].mxu1 }
 0x328   :  { %1785 = vrcp.f32 %v2389_v31  ;;  %v2419_v48 = vmul.f32 %v948_v61, %v870_v59  ;;  %v1551_v62 = vpop.f32.mrb[6].mxu1 }
 0x329   :  { %1787 = vrcp.f32 %v2399_v38  ;;  %v1039_v63 = vmul.f32 1.442695, %v2415_v24  ;;  %v2423_v0 = vmul.f32 %v1551_v62, %v873_v45  ;;  %v951_v51 = vpop.f32.mrb[7].mxu1  ;;  %vm1017_vm6 = vcmp.gt.f32.partialorder %v2415_v24, 0.0 }
 0x32a   :  { %1789 = vrcp.f32 %v2413_v23  ;;  %v1035_v60 = vmul.f32 1.442695, %v2419_v48  ;;  %v2427_v12 = vmul.f32 %v951_v51, %v871_v46  ;;  %vm1015_vm3 = vcmp.gt.f32.partialorder %v2419_v48, 0.0 }
 0x32b   :  { %1791 = vpow2.f32 %v1039_v63  ;;  %v1041_v43 = vmul.f32 1.442695, %v2423_v0  ;;  %vm1018_vm4 = vcmp.gt.f32.partialorder %v2423_v0, 0.0 }
 0x32c   :  { %1793 = vpow2.f32 %v1035_v60  ;;  %v1037_v1 = vmul.f32 1.442695, %v2427_v12  ;;  %vm1016_vm1 = vcmp.gt.f32.partialorder %v2427_v12, 0.0 }
 0x32d   :  { %v1776_v2 = vpop.eup %1775  ;;  %1795 = vpow2.f32 %v1041_v43 }
 0x32e   :  { %v1778_v4 = vpop.eup %1777  ;;  %1797 = vpow2.f32 %v1037_v1  ;;  %v1554_v7 = vpop.f32.mrb[8].mxu1  ;;  %v1450_v27 = vadd.f32 -1.0, %v1776_v2 }
 0x32f   :  { %v1780_v14 = vpop.eup %1779  ;;  %v1448_v15 = vadd.f32 -1.0, %v1778_v4  ;;  %v2437_v5 = vmul.f32 %v1554_v7, %v876_v18  ;;  %v964_v17 = vpop.f32.mrb[9].mxu1 }
 0x330   :  { %v1782_v26 = vpop.eup %1781  ;;  %v2440_v16 = vmul.f32 %v964_v17, %v874_v3  ;;  %v1555_v28 = vpop.f32.mrb[10].mxu1  ;;  %v1451_v32 = vadd.f32 -1.0, %v1780_v14  ;;  %v1077_v57 = vsel %vm1013_vm13, %v2393_v8, %v1450_v27 }
 0x331   :  { %v1784_v30 = vpop.eup %1783  ;;  %v1449_v34 = vadd.f32 -1.0, %v1782_v26  ;;  %v1047_v33 = vmul.f32 1.442695, %v2437_v5  ;;  %v2443_v35 = vmul.f32 %v1555_v28, %v877_v19  ;;  %v967_v36 = vpop.f32.mrb[11].mxu1  ;;  %v1075_v41 = vsel %vm1011_vm2, %v2396_v9, %v1448_v15 }
 0x332   :  { %v1786_v6 = vpop.eup %1785  ;;  %v1043_v20 = vmul.f32 1.442695, %v2440_v16  ;;  %v2448_v21 = vmul.f32 %v967_v36, %v875_v13  ;;  %v1078_v58 = vsel %vm1014_vm15, %v2402_v40, %v1451_v32  ;;  %v878_v11 = vsel %vm846_vm12, %v1784_v30, 0.0 }
 0x333   :  { %v1788_v37 = vpop.eup %1787  ;;  %1799 = vpow2.f32 %v1047_v33  ;;  %v1049_v39 = vmul.f32 1.442695, %v2443_v35  ;;  %v1076_v42 = vsel %vm1012_vm14, %v2406_v50, %v1449_v34  ;;  %v1108_v22 = vpack.c.bf16 %v1078_v58, %v1077_v57  ;;  %v1715_v57 = vld [vmem:[%s2524_s6 + $0x20] sm:$0xff]   ;;  %v1716_v58 = vld [vmem:[%s2524_s6 + $0x28] sm:$0xff]  }
 0x334   :  { %v1790_v49 = vpop.eup %1789  ;;  %1801 = vpow2.f32 %v1043_v20  ;;  %v1045_v52 = vmul.f32 1.442695, %v2448_v21  ;;  %v1107_v54 = vpack.c.bf16 %v1076_v42, %v1075_v41  ;;  %v880_v50 = vsel %vm848_vm0, %v1788_v37, 0.0 }
 0x335   :  { %v1792_v44 = vpop.eup %1791  ;;  %1803 = vpow2.f32 %v1049_v39  ;;  %v879_v8 = vsel %vm847_vm10, %v1786_v6, 0.0  ;;  %v881_v29 = vsel %vm849_vm8, %v1790_v49, 0.0  ;;  %vm1021_vm7 = vcmp.gt.f32.partialorder %v2437_v5, 0.0 }
 0x336   :  { %v1794_v9 = vpop.eup %1793  ;;  %1805 = vpow2.f32 %v1045_v52  ;;  %1560 = vmatprep.subr.bf16.mxu1 %v1107_v54  ;;  %v1454_v62 = vadd.f32 -1.0, %v1792_v44  ;;  %vm1022_vm11 = vcmp.gt.f32.partialorder %v2443_v35, 0.0  ;;  %vm1019_vm9 = vcmp.gt.f32.partialorder %v2440_v16, 0.0  ;;  %v1712_v52 = vld [vmem:[%s2524_s6 + $0x8] sm:$0xff]   ;;  %v1714_v44 = vld [vmem:[%s2524_s6 + $0x18] sm:$0xff]  }
 0x337   :  { %v1558_v10 = vpop.f32.mrb[12].mxu1  ;;  %v1796_v59 = vpop.eup %1795  ;;  %v1452_v38 = vadd.f32 -1.0, %v1794_v9  ;;  %1561 = vmatpush3.bf16.msra.mxu1 %v1107_v54  ;;  %vm1020_vm5 = vcmp.gt.f32.partialorder %v2448_v21, 0.0  ;;  %v1713_v54 = vld [vmem:[%s2524_s6 + $0x10] sm:$0xff]   ;;  %vm1818_vm14 = vmmov 0  }
 0x338   :  { %v2463_v61 = vmul.f32 %v1558_v10, %v880_v50  ;;  %v980_v45 = vpop.f32.mrb[13].mxu1  ;;  %v1798_v40 = vpop.eup %1797  ;;  %1562 = vmatprep.subr.bf16.mxu1 %v1108_v22  ;;  %v1455_v46 = vadd.f32 -1.0, %v1796_v59  ;;  %v1081_v18 = vsel %vm1017_vm6, %v2415_v24, %v1454_v62  ;;  %v1717_v9 = vld [vmem:[%s2524_s6 + $0x30] sm:$0xff]   ;;  %v1718_v50 = vld [vmem:[%s2524_s6 + $0x38] sm:$0xff]   ;;  %v1817_v10 = vmov 0.0  }
 0x339   :  { %v2468_v55 = vmul.f32 %v980_v45, %v878_v11  ;;  %v1559_v63 = vpop.f32.mrb[14].mxu1  ;;  %v1453_v51 = vadd.f32 -1.0, %v1798_v40  ;;  %v1079_v56 = vsel %vm1015_vm3, %v2419_v48, %v1452_v38  ;;  %1612 = vmatprep.subr.bf16.mxu0 %v1817_v10  ;;  %1628 = vmatprep.mubr.msk.bf16.mxu0 %vm1818_vm14, %v1817_v10  ;;  %vm1370_vm3 = vcmask 7168  }
 0x33a   :  { %v1055_v23 = vmul.f32 1.442695, %v2463_v61  ;;  %v1010_v47 = vmul.f32 %v1559_v63, %v881_v29  ;;  %v983_v60 = vpop.f32.mrb[15].mxu1  ;;  %v1082_v7 = vsel %vm1018_vm4, %v2423_v0, %v1455_v46  ;;  %vm1025_vm12 = vcmp.gt.f32.partialorder %v2463_v61, 0.0 }
 0x33b   :  { %v1051_v31 = vmul.f32 1.442695, %v2468_v55  ;;  %v1008_v25 = vmul.f32 %v983_v60, %v879_v8  ;;  %1563 = vmatpush3.bf16.msra.mxu1 %v1108_v22  ;;  %v1080_v1 = vsel %vm1016_vm1, %v2427_v12, %v1453_v51  ;;  %v1110_v48 = vpack.c.bf16 %v1082_v7, %v1081_v18  ;;  %v1274_v18 = vpop.permute.xlu1 %1273  ;;  %v1265_v7 = vpop.permute.xlu0 %1264 }
 0x33c   :  { %1807 = vpow2.f32 %v1055_v23  ;;  %v1057_v43 = vmul.f32 1.442695, %v1010_v47  ;;  %v1109_v3 = vpack.c.bf16 %v1080_v1, %v1079_v56  ;;  %vm1026_vm10 = vcmp.gt.f32.partialorder %v1010_v47, 0.0 }
 0x33d   :  { %1809 = vpow2.f32 %v1051_v31  ;;  %v1053_v2 = vmul.f32 1.442695, %v1008_v25  ;;  %v1800_v4 = vpop.eup %1799  ;;  %vm1023_vm13 = vcmp.gt.f32.partialorder %v2468_v55, 0.0  ;;  %vm1024_vm2 = vcmp.gt.f32.partialorder %v1008_v25, 0.0 }
 0x33e   :  { %1811 = vpow2.f32 %v1057_v43  ;;  %v1802_v13 = vpop.eup %1801  ;;  %v1458_v14 = vadd.f32 -1.0, %v1800_v4  ;;  %1564 = vmatprep.subr.bf16.mxu1 %v1109_v3 }
 0x33f   :  { %1813 = vpow2.f32 %v1053_v2  ;;  %v1804_v15 = vpop.eup %1803  ;;  %v1456_v12 = vadd.f32 -1.0, %v1802_v13  ;;  %1565 = vmatpush3.bf16.msra.mxu1 %v1109_v3  ;;  %v1261_v3 = vand.u32 127, %v606_v53  ;;  %v1819_v13 = vmov 1.0|1.0  }
 0x340   :  { %v1806_v17 = vpop.eup %1805  ;;  %v1459_v26 = vadd.f32 -1.0, %v1804_v15  ;;  %1566 = vmatprep.subr.bf16.mxu1 %v1110_v48  ;;  %v1085_v24 = vsel %vm1021_vm7, %v2437_v5, %v1458_v14 }
 0x341   :  { %v1457_v27 = vadd.f32 -1.0, %v1806_v17  ;;  %v1083_v19 = vsel %vm1019_vm9, %v2440_v16, %v1456_v12  ;;  %vm1275_vm15 = vcmp.eq.s32.totalorder %v1261_v3, %v1274_v18  ;;  %vm1266_vm0 = vcmp.eq.s32.totalorder %v1261_v3, %v1265_v7 }
 0x342   :  { %v1086_v0 = vsel %vm1022_vm11, %v2443_v35, %v1459_v26  ;;  %vm1476_vm8 = vmpackc.low %vm1275_vm15, %vm1275_vm15 }
 0x343   :  { %1567 = vmatpush3.bf16.msra.mxu1 %v1110_v48  ;;  %v1084_v28 = vsel %vm1020_vm5, %v2448_v21, %v1457_v27  ;;  %v1112_v30 = vpack.c.bf16 %v1086_v0, %v1085_v24  ;;  %vm1474_vm6 = vmpackc.low %vm1266_vm0, %vm1266_vm0 }
 0x344   :  { %v1111_v32 = vpack.c.bf16 %v1084_v28, %v1083_v19 }
 0x346   :  { %v1808_v34 = vpop.eup %1807  ;;  %1568 = vmatprep.subr.bf16.mxu1 %v1111_v32 }
 0x347   :  { %v1810_v33 = vpop.eup %1809  ;;  %v1462_v36 = vadd.f32 -1.0, %v1808_v34  ;;  %1569 = vmatpush3.bf16.msra.mxu1 %v1111_v32 }
 0x348   :  { %v1812_v6 = vpop.eup %1811  ;;  %v1460_v20 = vadd.f32 -1.0, %v1810_v33  ;;  %1570 = vmatprep.subr.bf16.mxu1 %v1112_v30 }
 0x349   :  { %v1814_v37 = vpop.eup %1813  ;;  %v1463_v39 = vadd.f32 -1.0, %v1812_v6  ;;  %v1089_v16 = vsel %vm1025_vm12, %v2463_v61, %v1462_v36 }
 0x34a   :  { %v1461_v5 = vadd.f32 -1.0, %v1814_v37  ;;  %v1087_v21 = vsel %vm1023_vm13, %v2468_v55, %v1460_v20 }
 0x34b   :  { %v1090_v35 = vsel %vm1026_vm10, %v1010_v47, %v1463_v39  ;;  %1571 = vmatpush3.bf16.msra.mxu1 %v1112_v30 }
 0x34c   :  { %v1088_v41 = vsel %vm1024_vm2, %v1008_v25, %v1461_v5  ;;  %v1114_v42 = vpack.c.bf16 %v1090_v35, %v1089_v16 }
 0x34d   :  { %v1113_v49 = vpack.c.bf16 %v1088_v41, %v1087_v21 }
 0x34f   :  { %1572 = vmatprep.subr.bf16.mxu1 %v1113_v49 }
 0x350   :  { %1573 = vmatpush3.bf16.msra.mxu1 %v1113_v49 }
 0x351   :  { %1574 = vmatprep.subr.bf16.mxu1 %v1114_v42 }
 0x354   :  { %1575 = vmatpush3.bf16.msra.mxu1 %v1114_v42 }
 0x355   :  { %1592 = vmatprep.subr.bf16.mxu1 %v1817_v10 }
 0x357   :  { %1577 = vmatmul.mubr.bf16.vlgmr.msra.gmra.mrb[16].mxu1 %v1712_v52 }
 0x358   :  { %1580 = vmatprep.mubr.bf16.mxu1 %v1713_v54 }
 0x35f   :  { %1581 = vmatmul.mubr.bf16.gmra.mrb[20].mxu1 %v1714_v44 }
 0x360   :  { %1584 = vmatprep.mubr.bf16.mxu1 %v1715_v57 }
 0x367   :  { %1585 = vmatmul.mubr.bf16.gmra.mrb[24].mxu1 %v1716_v58 }
 0x368   :  { %1588 = vmatprep.mubr.bf16.mxu1 %v1717_v9 }
 0x36f   :  { %1589 = vmatmul.mubr.bf16.gmra.mrb[28].mxu1 %v1718_v50 }
 0x370   :  { %1608 = vmatprep.mubr.msk.bf16.mxu1 %vm1818_vm14, %v1817_v10 }
 0x42a   :  { %v1578_v11 = vpop.f32.mrb[16].mxu1 }
 0x42b   :  { %v1197_v22 = vpop.f32.mrb[17].mxu1 }
 0x42c   :  { %v1579_v59 = vpop.f32.mrb[18].mxu1 }
 0x42d   :  { %v1280_v38 = vpack.c.bf16 %v1579_v59, %v1578_v11  ;;  %v1200_v61 = vpop.f32.mrb[19].mxu1 }
 0x42e   :  { %v1279_v45 = vpack.c.bf16 %v1200_v61, %v1197_v22 }
 0x430   :  { %1593 = vmatpush3.bf16.msra.mxu1 %v1279_v45  ;;  %1613 = vmatpush3.bf16.msra.mxu0 %v1279_v45 }
 0x431   :  { %1594 = vmatprep.subr.bf16.mxu1 %v1817_v10  ;;  %1614 = vmatprep.subr.bf16.mxu0 %v1817_v10 }
 0x432   :  { %v1582_v8 = vpop.f32.mrb[20].mxu1 }
 0x433   :  { %v1213_v40 = vpop.f32.mrb[21].mxu1 }
 0x434   :  { %v1583_v62 = vpop.f32.mrb[22].mxu1  ;;  %1595 = vmatpush3.bf16.msra.mxu1 %v1280_v38  ;;  %1615 = vmatpush3.bf16.msra.mxu0 %v1280_v38 }
 0x435   :  { %v1282_v55 = vpack.c.bf16 %v1583_v62, %v1582_v8  ;;  %v1216_v29 = vpop.f32.mrb[23].mxu1  ;;  %1596 = vmatprep.subr.bf16.mxu1 %v1817_v10  ;;  %1616 = vmatprep.subr.bf16.mxu0 %v1817_v10 }
 0x436   :  { %v1281_v63 = vpack.c.bf16 %v1216_v29, %v1213_v40 }
 0x438   :  { %1597 = vmatpush3.bf16.msra.mxu1 %v1281_v63  ;;  %1617 = vmatpush3.bf16.msra.mxu0 %v1281_v63 }
 0x439   :  { %1598 = vmatprep.subr.bf16.mxu1 %v1817_v10  ;;  %1618 = vmatprep.subr.bf16.mxu0 %v1817_v10 }
 0x43a   :  { %v1586_v46 = vpop.f32.mrb[24].mxu1 }
 0x43b   :  { %v1229_v51 = vpop.f32.mrb[25].mxu1 }
 0x43c   :  { %v1587_v23 = vpop.f32.mrb[26].mxu1  ;;  %1599 = vmatpush3.bf16.msra.mxu1 %v1282_v55  ;;  %1619 = vmatpush3.bf16.msra.mxu0 %v1282_v55 }
 0x43d   :  { %v1284_v47 = vpack.c.bf16 %v1587_v23, %v1586_v46  ;;  %v1232_v60 = vpop.f32.mrb[27].mxu1  ;;  %1600 = vmatprep.subr.bf16.mxu1 %v1817_v10  ;;  %1620 = vmatprep.subr.bf16.mxu0 %v1817_v10 }
 0x43e   :  { %v1283_v31 = vpack.c.bf16 %v1232_v60, %v1229_v51 }
 0x440   :  { %1601 = vmatpush3.bf16.msra.mxu1 %v1283_v31  ;;  %1621 = vmatpush3.bf16.msra.mxu0 %v1283_v31 }
 0x441   :  { %1602 = vmatprep.subr.bf16.mxu1 %v1817_v10  ;;  %1622 = vmatprep.subr.bf16.mxu0 %v1817_v10 }
 0x442   :  { %v1590_v25 = vpop.f32.mrb[28].mxu1 }
 0x443   :  { %v1245_v43 = vpop.f32.mrb[29].mxu1 }
 0x444   :  { %v1591_v56 = vpop.f32.mrb[30].mxu1  ;;  %1603 = vmatpush3.bf16.msra.mxu1 %v1284_v47  ;;  %1623 = vmatpush3.bf16.msra.mxu0 %v1284_v47 }
 0x445   :  { %v1286_v1 = vpack.c.bf16 %v1591_v56, %v1590_v25  ;;  %v1248_v2 = vpop.f32.mrb[31].mxu1  ;;  %1604 = vmatprep.subr.bf16.mxu1 %v1817_v10  ;;  %1624 = vmatprep.subr.bf16.mxu0 %v1817_v10 }
 0x446   :  { %v1285_v4 = vpack.c.bf16 %v1248_v2, %v1245_v43 }
 0x448   :  { %1605 = vmatpush3.bf16.msra.mxu1 %v1285_v4  ;;  %1625 = vmatpush3.bf16.msra.mxu0 %v1285_v4 }
 0x449   :  { %1606 = vmatprep.subr.bf16.mxu1 %v1817_v10  ;;  %1626 = vmatprep.subr.bf16.mxu0 %v1817_v10 }
 0x44c   :  { %1607 = vmatpush3.bf16.msra.mxu1 %v1286_v1  ;;  %1627 = vmatpush3.bf16.msra.mxu0 %v1286_v1 }
 0x44f   :  { %1609 = vmatmul.mubr.msk.bf16.vlgmr.msra.gmra.mrb[32].mxu1 %vm1474_vm6, %v1819_v13  ;;  %1629 = vmatmul.mubr.msk.bf16.vlgmr.msra.gmra.mrb[32].mxu0 %vm1476_vm8, %v1819_v13 }
 0x522   :  { %v1321_v14 = vpop.f32.mrb[32].mxu1  ;;  %v1361_v48 = vpop.f32.mrb[32].mxu0 }
 0x523   :  { %v1367_v15 = vmul.f32 %v1361_v48, %v1321_v14  ;;  %v1610_v53 = vpop.f32.mrb[33].mxu1  ;;  %v1630_v12 = vpop.f32.mrb[33].mxu0 }
 0x524   :  { %v1324_v17 = vpop.f32.mrb[34].mxu1  ;;  %v1364_v26 = vpop.f32.mrb[34].mxu0 }
 0x525   :  { %v1631_v27 = vpop.f32.mrb[35].mxu0  ;;  %1368 = vadd.xlane.f32.xlu0 %v1367_v15  ;;  %v1611_v24 = vpop.f32.mrb[35].mxu1 }
 0x5b2   :  { %v1369_v0 = vpop.xlane.xlu0 %1368 }
 0x5b3   :  { %1371 = vst.msk [vmem:[%s2525_s7] sm:$0xff] %vm1370_vm3, %v1369_v0 }

</bundles_post_ra>
